<compile_context>
chip_gen: v6e
topology: v6e:2x2x1
jax: 0.10.0
libtpu: 0.0.40
codegen_flags: <defaults>
</compile_context>

<pallas_src>
import functools
import math

import jax
import jax.numpy as jnp
import numpy as np
from jax.experimental import pallas as pl
from jax.experimental.pallas import tpu as pltpu

VOCAB_PAD = 128  # lane-dense one-hot width / MXU K dim (>= 95)


def embedding_block_kernel(idx_ref, emb_ref, o_ref, *, vocab_pad: int):
    """One node-tile: gather table rows via one-hot MXU matmul, then swish."""
    tile_n = o_ref.shape[0]
    idx = idx_ref[...]                                                   # (tile_n, 1) int32
    lane_iota = jax.lax.broadcasted_iota(jnp.int32, (tile_n, vocab_pad), 1)
    one_hot = (idx == lane_iota).astype(jnp.float32)                     # (tile_n, V_pad)
    g = jnp.dot(one_hot, emb_ref[...],
                preferred_element_type=jnp.float32,
                precision=jax.lax.Precision.HIGHEST)                     # exact f32 gather
    # swish(g) = g * sigmoid(g); exp goes to the EUP slot, reciprocal exact.
    o_ref[...] = g * pl.reciprocal(1.0 + jnp.exp(-g), approx=False)


def pad_embedding_table(emb_weight):
    """Pad the (95, H) table to (128, H) once at module init (hoisted out of the call path)."""
    vocab, hidden = emb_weight.shape
    assert vocab <= VOCAB_PAD
    return (jnp.zeros((VOCAB_PAD, hidden), jnp.float32)
            .at[:vocab].set(emb_weight.astype(jnp.float32)))


def _pick_tile_n(n: int, max_tile: int = 1024) -> int:
    """Large tiles to amortize per-step overhead; >=2 steps for v7x megacore."""
    if n <= max_tile:
        return n                                      # single full-extent block
    # multiple-of-128 tiles so only the (clipped) last block is ragged
    half = ((pl.cdiv(n, 2) + 127) // 128) * 128
    return min(max_tile, half)


@functools.partial(jax.jit, static_argnames=("tile_n",))
def embedding_block(x_idx, emb_pad, tile_n=None):
    """swish(emb_pad[x_idx]) with a node-tiled Pallas kernel. emb_pad is (128, H)."""
    n = x_idx.shape[0]
    vocab_pad, hidden = emb_pad.shape
    if tile_n is None:
        tile_n = _pick_tile_n(n)
    tile_n = min(tile_n, n)
    grid = (pl.cdiv(n, tile_n),)

    idx2d = x_idx.astype(jnp.int32).reshape(n, 1)     # no padding; ragged block is clipped

    out = pl.pallas_call(
        functools.partial(embedding_block_kernel, vocab_pad=vocab_pad),
        out_shape=jax.ShapeDtypeStruct((n, hidden), jnp.float32),
        grid_spec=pltpu.PrefetchScalarGridSpec(
            num_scalar_prefetch=0,
            grid=grid,
            in_specs=[
                pl.BlockSpec((tile_n, 1), lambda i: (i, 0)),          # node-index tile
                pl.BlockSpec((vocab_pad, hidden), lambda i: (0, 0)),  # VMEM-resident table
            ],
            out_specs=pl.BlockSpec((tile_n, hidden), lambda i: (i, 0)),
        ),
        compiler_params=pltpu.CompilerParams(
            dimension_semantics=("parallel",),        # megacore split on v7x
        ),
        cost_estimate=pl.CostEstimate(                # honest: mem-bound gather + swish
            flops=2 * n * hidden,
            transcendentals=n * hidden,
            bytes_accessed=n * 4 + vocab_pad * hidden * 4 + n * hidden * 4,
        ),
    )(idx2d, emb_pad)
    return out


def reference(x_idx, emb_weight):
    """Pure-JAX reference mirroring the PyTorch module: swish(Embedding(x))."""
    g = emb_weight[x_idx]
    return g * jax.nn.sigmoid(g)


if __name__ == "__main__":
    H = 128                       # hidden_channels (lane-dense)
    VOCAB = 95                    # atomic-number vocabulary of EmbeddingBlock

    key = jax.random.PRNGKey(0)
    k_idx, k_emb, k_idx2 = jax.random.split(key, 3)
    emb_weight = jax.random.uniform(
        k_emb, (VOCAB, H), jnp.float32, -math.sqrt(3.0), math.sqrt(3.0))
    emb_pad = pad_embedding_table(emb_weight)   # built once, outside the call path

    # Small graph (single full-extent tile, N not a multiple of 8/128).
    N = 200
    x = jax.random.randint(k_idx, (N,), 0, VOCAB, jnp.int32)
    out = jax.block_until_ready(embedding_block(x, emb_pad))
    assert out.shape == (N, H)
    np.testing.assert_allclose(np.asarray(out), np.asarray(reference(x, emb_weight)),
                               rtol=1e-4, atol=1e-4)

    # Larger graph: exercises multi-step grid + ragged (clipped) last block.
    N2 = 2500
    x2 = jax.random.randint(k_idx2, (N2,), 0, VOCAB, jnp.int32)
    out2 = jax.block_until_ready(embedding_block(x2, emb_pad))
    assert out2.shape == (N2, H)
    np.testing.assert_allclose(np.asarray(out2), np.asarray(reference(x2, emb_weight)),
                               rtol=1e-4, atol=1e-4)

    print("KERNEL_OK")
</pallas_src>

<mosaic_0001>
module attributes {stable_mosaic.version = 11 : i64} {
  func.func @embedding_block_kernel(%arg0: i32, %arg1: memref<200x1xi32, #tpu.memory_space<vmem>>, %arg2: memref<128x128xf32, #tpu.memory_space<vmem>>, %arg3: memref<200x128xf32, #tpu.memory_space<vmem>>) attributes {dimension_semantics = [#tpu.dimension_semantics<parallel>], iteration_bounds = array<i64: 1>, scalar_prefetch = 0 : i64, scratch_operands = 0 : i64, tpu.core_type = #tpu.core_type<tc>, window_params = [{transform_indices = @transform_0, window_bounds = array<i64: 200, 1>}, {pipeline_mode = #tpu.pipeline_mode<synchronous>, transform_indices = @transform_1, window_bounds = array<i64: 128, 128>}, {transform_indices = @transform_2, window_bounds = array<i64: 200, 128>}]} {
    %c0 = arith.constant 0 : index
    %c0_0 = arith.constant 0 : index
    %0 = vector.load %arg1[%c0, %c0_0] : memref<200x1xi32, #tpu.memory_space<vmem>>, vector<200x1xi32>
    %1 = tpu.iota {dimensions = array<i32: 1>} : vector<200x128xi32>
    %2 = vector.broadcast %0 : vector<200x1xi32> to vector<200x128xi32>
    %3 = arith.cmpi eq, %2, %1 : vector<200x128xi32>
    %4 = arith.extui %3 : vector<200x128xi1> to vector<200x128xi32>
    %5 = arith.sitofp %4 : vector<200x128xi32> to vector<200x128xf32>
    %c0_1 = arith.constant 0 : index
    %c0_2 = arith.constant 0 : index
    %6 = vector.load %arg2[%c0_1, %c0_2] : memref<128x128xf32, #tpu.memory_space<vmem>>, vector<128x128xf32>
    %cst = arith.constant dense<0.000000e+00> : vector<200x128xf32>
    %7 = tpu.matmul %5, %6, %cst {dimension_numbers = #tpu.dot_dimension_numbers<[1], [0], [0], [1], [0, 0, 1, 1], [], []>, precision = #tpu.contract_precision<fp32>} : vector<200x128xf32>, vector<128x128xf32>, vector<200x128xf32> -> vector<200x128xf32>
    %cst_3 = arith.constant 0.000000e+00 : f32
    %8 = vector.broadcast %cst_3 : f32 to vector<200x128xf32>
    %9 = arith.subf %8, %7 : vector<200x128xf32>
    %10 = math.exp %9 : vector<200x128xf32>
    %cst_4 = arith.constant 1.000000e+00 : f32
    %11 = vector.broadcast %cst_4 : f32 to vector<200x128xf32>
    %12 = arith.addf %11, %10 : vector<200x128xf32>
    %13 = tpu.reciprocal %12 : vector<200x128xf32> -> vector<200x128xf32>
    %14 = arith.mulf %7, %13 : vector<200x128xf32>
    %c0_5 = arith.constant 0 : index
    %c0_6 = arith.constant 0 : index
    %15 = vector.load %arg3[%c0_5, %c0_6] : memref<200x128xf32, #tpu.memory_space<vmem>>, vector<200x128xf32>
    tpu.vector_store %arg3[%c0_5, %c0_6], %14 {strides = array<i32>} : memref<200x128xf32, #tpu.memory_space<vmem>>, vector<200x128xf32>,
    return
  }
  func.func @transform_0(%arg0: i32) -> (i32, i32) {
    %c0_i32 = arith.constant 0 : i32
    %c0_i32_0 = arith.constant 0 : i32
    return %arg0, %c0_i32 : i32, i32
  }
  func.func @transform_1(%arg0: i32) -> (i32, i32) {
    %c0_i32 = arith.constant 0 : i32
    %c0_i32_0 = arith.constant 0 : i32
    %c0_i32_1 = arith.constant 0 : i32
    return %c0_i32, %c0_i32_0 : i32, i32
  }
  func.func @transform_2(%arg0: i32) -> (i32, i32) {
    %c0_i32 = arith.constant 0 : i32
    %c0_i32_0 = arith.constant 0 : i32
    return %arg0, %c0_i32 : i32, i32
  }
}

</mosaic_0001>

<bundles_post_ra>
// kernel: embedding_block.1
= control target key start
LH: loop header
LB: loop body
LE: loop exit
PB: predicated region body
PF: predicated region fallthrough
CT: control target
= control target key end

     0   :  { %v3188_v2 = vmov 0   ;;  %v3189_v5 = vmov 0.0   ;;  %vm3190_vm0 = vmmov 0   ;;  %s4941_s0 = inlined_call_operand.vmem [shape: s32[200,1], index: 0, kind: input, shape index: {}]   ;;  %s4942_s1 = inlined_call_operand.vmem [shape: f32[128,128], index: 1, kind: input, shape index: {}]   ;;  %s4943_s2 = inlined_call_operand.hbm [shape: f32[200,128], index: 2, kind: output, shape index: {}]  }
   0x1   :  { %v14_v0 = vld [vmem:[%s4941_s0 + $0x10] sm:$0xff]  ;;  %v12_v1 = vld [vmem:[%s4941_s0] sm:$0xff]  ;;  %3065 = vset.pattern.permute.xlu1 %v3188_v2  ;;  %3064 = vset.pattern.permute.xlu0 %v3188_v2  ;;  %v15_v3 = vld [vmem:[%s4941_s0 + $0x18] sm:$0xff] }
   0x2   :  { %46 = vperm.xlu1 %3065, %v14_v0   ;;  %40 = vperm.xlu0 %3064, %v12_v1   ;;  %v13_v4 = vld [vmem:[%s4941_s0 + $0x8] sm:$0xff]  ;;  %v16_v7 = vld [vmem:[%s4941_s0 + $0x20] sm:$0xff]  ;;  %v204_v8 = vld [vmem:[%s4942_s1 + $0x78] sm:$0xff] }
   0x3   :  { %2522 = vmatprep.subr.mxu1 %v3189_v5  ;;  %2415 = vmatprep.subr.mxu0 %v3189_v5  ;;  %v17_v6 = vld [vmem:[%s4941_s0 + $0x28] sm:$0xff]  ;;  %v203_v9 = vld [vmem:[%s4942_s1 + $0x70] sm:$0xff]  ;;  %v3240_v10 = vand.u32 4294901760, %v204_v8  ;;  %v201_v13 = vld [vmem:[%s4942_s1 + $0x60] sm:$0xff] }
   0x4   :  { %2554 = vmatprep.mubr.msk.f32.mxu1 %vm3190_vm0, %v3189_v5  ;;  %2447 = vmatprep.mubr.msk.f32.mxu0 %vm3190_vm0, %v3189_v5  ;;  %v3242_v11 = vand.u32 4294901760, %v203_v9  ;;  %v202_v12 = vld [vmem:[%s4942_s1 + $0x68] sm:$0xff]  ;;  %v200_v14 = vld [vmem:[%s4942_s1 + $0x58] sm:$0xff]  ;;  %v3255_v16 = vand.u32 4294901760, %v201_v13  ;;  %v199_v18 = vld [vmem:[%s4942_s1 + $0x50] sm:$0xff] }
   0x5   :  { %v3253_v15 = vand.u32 4294901760, %v202_v12  ;;  %v3257_v17 = vand.u32 4294901760, %v200_v14  ;;  %v19_v19 = vld [vmem:[%s4941_s0 + $0x38] sm:$0xff]  ;;  %v18_v20 = vld [vmem:[%s4941_s0 + $0x30] sm:$0xff]  ;;  %v3269_v21 = vsub.f32 %v204_v8, %v3240_v10  ;;  %2416 = vmatpush3.msra.mxu0 %v3240_v10  ;;  %v3282_v25 = vand.u32 4294901760, %v199_v18  ;;  %v198_v26 = vld [vmem:[%s4942_s1 + $0x48] sm:$0xff] }
   0x6   :  { %49 = vperm.xlu1 %3065, %v15_v3   ;;  %43 = vperm.xlu0 %3064, %v13_v4   ;;  %v3272_v22 = vsub.f32 %v203_v9, %v3242_v11  ;;  %v3279_v24 = vsub.f32 %v201_v13, %v3255_v16 }
   0x7   :  { %v3276_v23 = vsub.f32 %v202_v12, %v3253_v15  ;;  %2417 = vmatprep.subr.mxu0 %v3189_v5  ;;  %v4962_v27 = vand.u32 4294901760, %v3269_v21  ;;  %v3290_v29 = vsub.f32 %v200_v14, %v3257_v17 }
   0x8   :  { %v4959_v28 = vand.u32 4294901760, %v3272_v22  ;;  %2418 = vmatpush3.msra.mxu0 %v3242_v11 }
   0xa   :  { %55 = vperm.xlu1 %3065, %v17_v6   ;;  %52 = vperm.xlu0 %3064, %v16_v7  }
   0xb   :  { %7 = vsyncpa [#allocation3], 0  ;;  %v4957_v30 = vand.u32 4294901760, %v3276_v23  ;;  %v197_v31 = vld [vmem:[%s4942_s1 + $0x40] sm:$0xff]  ;;  %v21_v32 = vld [vmem:[%s4941_s0 + $0x48] sm:$0xff]  ;;  %v540_v34 = vsub.f32 %v3269_v21, %v4962_v27  ;;  %v547_v35 = vsub.f32 %v3272_v22, %v4959_v28  ;;  %v4956_v36 = vand.u32 4294901760, %v3279_v24  ;;  %2419 = vmatprep.subr.mxu0 %v3189_v5 }
   0xc   :  { %v20_v33 = vld [vmem:[%s4941_s0 + $0x40] sm:$0xff]  ;;  %v3311_v37 = vand.u32 4294901760, %v198_v26  ;;  %v3317_v39 = vsub.f32 %v199_v18, %v3282_v25  ;;  %2420 = vmatpush3.msra.mxu0 %v3253_v15  ;;  %v4955_v42 = vand.u32 4294901760, %v3290_v29  ;;  %v3322_v43 = vand.u32 4294901760, %v197_v31  ;;  %v196_v44 = vld [vmem:[%s4942_s1 + $0x38] sm:$0xff]  ;;  %v22_v46 = vld [vmem:[%s4941_s0 + $0x50] sm:$0xff] }
   0xd   :  { %v554_v38 = vsub.f32 %v3276_v23, %v4957_v30  ;;  %v541_v40 = vand.u32 4294901760, %v540_v34  ;;  %v548_v41 = vand.u32 4294901760, %v547_v35  ;;  %2421 = vmatprep.subr.mxu0 %v3189_v5  ;;  %v23_v45 = vld [vmem:[%s4941_s0 + $0x58] sm:$0xff]  ;;  %v561_v47 = vsub.f32 %v3279_v24, %v4956_v36  ;;  %v195_v52 = vld [vmem:[%s4942_s1 + $0x30] sm:$0xff]  ;;  %v194_v55 = vld [vmem:[%s4942_s1 + $0x28] sm:$0xff] }
   0xe   :  { %61 = vperm.xlu1 %3065, %v19_v19   ;;  %58 = vperm.xlu0 %3064, %v18_v20   ;;  %v3337_v48 = vsub.f32 %v198_v26, %v3311_v37  ;;  %v4954_v50 = vand.u32 4294901760, %v3317_v39  ;;  %v3343_v51 = vand.u32 4294901760, %v196_v44  ;;  %v568_v53 = vsub.f32 %v3290_v29, %v4955_v42  ;;  %v25_v56 = vld [vmem:[%s4941_s0 + $0x68] sm:$0xff]  ;;  %v24_v57 = vld [vmem:[%s4941_s0 + $0x60] sm:$0xff]  ;;  %v27_v3 = vld [vmem:[%s4941_s0 + $0x78] sm:$0xff] }
   0xf   :  { %2523 = vmatpush3.msra.mxu1 %v541_v40  ;;  %2422 = vmatpush3.msra.mxu0 %v3255_v16  ;;  %v555_v49 = vand.u32 4294901760, %v554_v38  ;;  %v3352_v54 = vsub.f32 %v197_v31, %v3322_v43  ;;  %v562_v58 = vand.u32 4294901760, %v561_v47  ;;  %v3367_v60 = vand.u32 4294901760, %v195_v52  ;;  %v193_v2 = vld [vmem:[%s4942_s1 + $0x20] sm:$0xff]  ;;  %v26_v4 = vld [vmem:[%s4941_s0 + $0x70] sm:$0xff]  ;;  %v192_v8 = vld [vmem:[%s4942_s1 + $0x18] sm:$0xff] }
  0x10   :  { %2524 = vmatprep.subr.mxu1 %v3189_v5  ;;  %2423 = vmatprep.subr.mxu0 %v3189_v5  ;;  %v4953_v59 = vand.u32 4294901760, %v3337_v48  ;;  %v575_v61 = vsub.f32 %v3317_v39, %v4954_v50  ;;  %v3373_v62 = vsub.f32 %v196_v44, %v3343_v51  ;;  %v569_v63 = vand.u32 4294901760, %v568_v53  ;;  %v191_v19 = vld [vmem:[%s4942_s1 + $0x10] sm:$0xff]  ;;  %v29_v26 = vld [vmem:[%s4941_s0 + $0x88] sm:$0xff]  ;;  %v28_v31 = vld [vmem:[%s4941_s0 + $0x80] sm:$0xff] }
  0x11   :  { %2525 = vmatpush3.msra.mxu1 %v548_v41  ;;  %2424 = vmatpush3.msra.mxu0 %v3257_v17  ;;  %v4952_v0 = vand.u32 4294901760, %v3352_v54  ;;  %v3379_v1 = vand.u32 4294901760, %v194_v55  ;;  %v3394_v7 = vsub.f32 %v195_v52, %v3367_v60  ;;  %v3403_v13 = vand.u32 4294901760, %v193_v2  ;;  %v190_v34 = vld [vmem:[%s4942_s1 + $0x8] sm:$0xff]  ;;  %v30_v52 = vld [vmem:[%s4941_s0 + $0x90] sm:$0xff] }
  0x12   :  { %67 = vperm.xlu1 %3065, %v21_v32   ;;  %64 = vperm.xlu0 %3064, %v20_v33   ;;  %v582_v6 = vsub.f32 %v3337_v48, %v4953_v59  ;;  %v576_v9 = vand.u32 4294901760, %v575_v61  ;;  %v4951_v12 = vand.u32 4294901760, %v3373_v62  ;;  %v3415_v20 = vand.u32 4294901760, %v192_v8 }
  0x13   :  { %2526 = vmatprep.subr.mxu1 %v3189_v5  ;;  %2425 = vmatprep.subr.mxu0 %v3189_v5  ;;  %v589_v14 = vsub.f32 %v3352_v54, %v4952_v0  ;;  %v3409_v18 = vsub.f32 %v194_v55, %v3379_v1  ;;  %v4950_v33 = vand.u32 4294901760, %v3394_v7  ;;  %v3433_v38 = vsub.f32 %v193_v2, %v3403_v13 }
  0x14   :  { %2527 = vmatpush3.msra.mxu1 %v555_v49  ;;  %2426 = vmatpush3.msra.mxu0 %v3282_v25  ;;  %v583_v32 = vand.u32 4294901760, %v582_v6  ;;  %v596_v35 = vsub.f32 %v3373_v62, %v4951_v12  ;;  %v3436_v40 = vand.u32 4294901760, %v191_v19  ;;  %v3447_v47 = vand.u32 4294901760, %v190_v34  ;;  %v31_v49 = vld [vmem:[%s4941_s0 + $0x98] sm:$0xff] }
  0x15   :  { %2528 = vmatprep.subr.mxu1 %v3189_v5  ;;  %2427 = vmatprep.subr.mxu0 %v3189_v5  ;;  %v590_v41 = vand.u32 4294901760, %v589_v14  ;;  %v4949_v44 = vand.u32 4294901760, %v3409_v18  ;;  %v603_v53 = vsub.f32 %v3394_v7, %v4950_v33 }
  0x16   :  { %73 = vperm.xlu1 %3065, %v23_v45   ;;  %70 = vperm.xlu0 %3064, %v22_v46   ;;  %v189_v45 = vld [vmem:[%s4942_s1] sm:$0xff]  ;;  %v3445_v46 = vsub.f32 %v192_v8, %v3415_v20  ;;  %v597_v55 = vand.u32 4294901760, %v596_v35  ;;  %v3473_v2 = vsub.f32 %v190_v34, %v3447_v47  ;;  %v34_v34 = vld [vmem:[%s4941_s0 + $0xb0] sm:$0xff] }
  0x17   :  { %2529 = vmatpush3.msra.mxu1 %v562_v58  ;;  %2428 = vmatpush3.msra.mxu0 %v3311_v37  ;;  %v3465_v58 = vand.u32 4294901760, %v189_v45  ;;  %v610_v61 = vsub.f32 %v3409_v18, %v4949_v44  ;;  %v604_v6 = vand.u32 4294901760, %v603_v53  ;;  %v36_v53 = vld [vmem:[%s4941_s0 + $0xc0] sm:$0xff] }
  0x18   :  { %2530 = vmatprep.subr.mxu1 %v3189_v5  ;;  %2429 = vmatprep.subr.mxu0 %v3189_v5 }
  0x19   :  { %2531 = vmatpush3.msra.mxu1 %v569_v63  ;;  %2430 = vmatpush3.msra.mxu0 %v3322_v43  ;;  %5049 = vst [vmem:[#allocation5_spill] sm:$0xff] %v3465_v58  ;;  %v4947_v63 = vand.u32 4294901760, %v3445_v46  ;;  %v3489_v14 = vsub.f32 %v189_v45, %v3465_v58 }
  0x1a   :  { %79 = vperm.xlu1 %3065, %v25_v56   ;;  %76 = vperm.xlu0 %3064, %v24_v57   ;;  %v4948_v56 = vand.u32 4294901760, %v3433_v38  ;;  %v3462_v57 = vsub.f32 %v191_v19, %v3436_v40  ;;  %v611_v19 = vand.u32 4294901760, %v610_v61 }
  0x1b   :  { %2532 = vmatprep.subr.mxu1 %v3189_v5  ;;  %2431 = vmatprep.subr.mxu0 %v3189_v5  ;;  %5050 = vst [vmem:[#allocation6_spill] sm:$0xff] %v3489_v14  ;;  %v4944_v45 = vand.u32 4294901760, %v3489_v14 }
  0x1c   :  { %2533 = vmatpush3.msra.mxu1 %v576_v9  ;;  %2432 = vmatpush3.msra.mxu0 %v3343_v51  ;;  %v617_v8 = vsub.f32 %v3433_v38, %v4948_v56  ;;  %v4946_v9 = vand.u32 4294901760, %v3462_v57 }
  0x1d   :  { %2534 = vmatprep.subr.mxu1 %v3189_v5  ;;  %2433 = vmatprep.subr.mxu0 %v3189_v5  ;;  %v645_v61 = vsub.f32 %v3489_v14, %v4944_v45 }
  0x1e   :  { %85 = vperm.xlu1 %3065, %v27_v3   ;;  %82 = vperm.xlu0 %3064, %v26_v4   ;;  %v33_v3 = vld [vmem:[%s4941_s0 + $0xa8] sm:$0xff]  ;;  %v32_v4 = vld [vmem:[%s4941_s0 + $0xa0] sm:$0xff]  ;;  %v618_v35 = vand.u32 4294901760, %v617_v8 }
  0x1f   :  { %2535 = vmatpush3.msra.mxu1 %v583_v32  ;;  %2434 = vmatpush3.msra.mxu0 %v3367_v60  ;;  %v35_v32 = vld [vmem:[%s4941_s0 + $0xb8] sm:$0xff]  ;;  %s3192_s0 = smov [#allocation2]  }
  0x20   :  { %2536 = vmatprep.subr.mxu1 %v3189_v5  ;;  %2435 = vmatprep.subr.mxu0 %v3189_v5  ;;  %s2058_s6 = sshll.u32 %s3192_s0, 4  ;;  %s2059_s6 = int_to_ptr.vmem [resolvable:$true] %s2058_s6 }
  0x21   :  { %2537 = vmatpush3.msra.mxu1 %v590_v41  ;;  %2436 = vmatpush3.msra.mxu0 %v3379_v1  ;;  %v631_v41 = vsub.f32 %v3462_v57, %v4946_v9  ;;  %s3166_s7 = scalar_lea.vmem %s2059_s6, 3200  ;;  %p3171_p1 = scmp.lt.s32.totalorder %s2059_s6, %s2059_s6 }
  0x22   :  { %91 = vperm.xlu1 %3065, %v29_v26   ;;  %88 = vperm.xlu0 %3064, %v28_v31   ;;  %v624_v26 = vsub.f32 %v3445_v46, %v4947_v63  ;;  %v4945_v31 = vand.u32 4294901760, %v3473_v2  ;;  %p3167_p0 = scmp.ne.s32.totalorder %s2059_s6, %s3166_s7  ;;  %p3172_p2 = scmp.lt.s32.totalorder %s3166_s7, %s3166_s7 }
  0x23   :  { %2538 = vmatprep.subr.mxu1 %v3189_v5  ;;  %2437 = vmatprep.subr.mxu0 %v3189_v5 }
  0x24   :  { %2539 = vmatpush3.msra.mxu1 %v597_v55  ;;  %2438 = vmatpush3.msra.mxu0 %v3403_v13  ;;  %v632_v55 = vand.u32 4294901760, %v631_v41  ;;  %p3173_p3 = por %p3172_p2, %p3171_p1 }
  0x25   :  { %2540 = vmatprep.subr.mxu1 %v3189_v5  ;;  %2439 = vmatprep.subr.mxu0 %v3189_v5 }
  0x26   :  { %97 = vperm.xlu1 %3065, %v31_v49   ;;  %94 = vperm.xlu0 %3064, %v30_v52   ;;  %v625_v49 = vand.u32 4294901760, %v624_v26  ;;  %v638_v52 = vsub.f32 %v3473_v2, %v4945_v31  ;;  %p3174_p4 = pnand %p3173_p3, %p3167_p0 }
  0x27   :  { %2541 = vmatpush3.msra.mxu1 %v604_v6  ;;  %2440 = vmatpush3.msra.mxu0 %v3415_v20  ;;  %v37_v6 = vlaneseq }
  0x28   :  { %2542 = vmatprep.subr.mxu1 %v3189_v5  ;;  %2441 = vmatprep.subr.mxu0 %v3189_v5 }
  0x29   :  { %2543 = vmatpush3.msra.mxu1 %v611_v19  ;;  %2442 = vmatpush3.msra.mxu0 %v3436_v40  ;;  %v3531_v8 = vand.u32 127, %v37_v6 }
  0x2a   :  { %103 = vperm.xlu1 %3065, %v33_v3   ;;  %100 = vperm.xlu0 %3064, %v32_v4   ;;  %v639_v3 = vand.u32 4294901760, %v638_v52  ;;  %v646_v4 = vand.u32 4294901760, %v645_v61 }
  0x2b   :  { %2544 = vmatprep.subr.mxu1 %v3189_v5  ;;  %2443 = vmatprep.subr.mxu0 %v3189_v5 }
  0x2c   :  { %2545 = vmatpush3.msra.mxu1 %v618_v35  ;;  %2444 = vmatpush3.msra.mxu0 %v3447_v47  ;;  %v4968_v35 = vmov 1.0  }
  0x2d   :  { %2546 = vmatprep.subr.mxu1 %v3189_v5  ;;  %2445 = vmatprep.subr.mxu0 %v3189_v5 }
  0x2e   :  { %109 = vperm.xlu1 %3065, %v35_v32   ;;  %106 = vperm.xlu0 %3064, %v34_v34  }
  0x2f   :  { %2547 = vmatpush3.msra.mxu1 %v625_v49  ;;  %2446 = vmatpush3.msra.mxu0 %v3465_v58 }
  0x30   :  { %2548 = vmatprep.subr.mxu1 %v3189_v5  ;;  %2629 = vmatprep.subr.mxu0 %v3189_v5 }
  0x31   :  { %2549 = vmatpush3.msra.mxu1 %v632_v55 }
  0x32   :  { %112 = vperm.xlu0 %3064, %v36_v53   ;;  %2550 = vmatprep.subr.mxu1 %v3189_v5 }
  0x33   :  { %2551 = vmatpush3.msra.mxu1 %v639_v3 }
  0x34   :  { %2552 = vmatprep.subr.mxu1 %v3189_v5 }
  0x35   :  { %2553 = vmatpush3.msra.mxu1 %v646_v4 }
  0x36   :  { %2736 = vmatprep.subr.mxu1 %v3189_v5 }
  0x7d   :  { %v3533_v19 = vpop.permute.xlu1 %46  ;;  %v3535_v26 = vpop.permute.xlu0 %40 }
  0x7e   :  { %5051 = vst [vmem:[#allocation7_spill] sm:$0xff] %v3533_v19  ;;  %5052 = vst [vmem:[#allocation8_spill] sm:$0xff] %v3535_v26  ;;  %vm116_vm1 = vcmp.eq.s32.totalorder %v3533_v19, %v3531_v8  ;;  %vm114_vm2 = vcmp.eq.s32.totalorder %v3535_v26, %v3531_v8 }
  0x7f   :  { %v2071_v32 = vsel %vm116_vm1, 1.0, %v3189_v5  ;;  %v2069_v34 = vsel %vm114_vm2, 1.0, %v3189_v5  ;;  %2555 = vmatmul.mubr.msk.f32.vlgmr.msra.gmra.mxu1 %vm114_vm2, %v4968_v35 }
  0x80   :  { %v3553_v41 = vsub.f32 %v2069_v34, %v2069_v34  ;;  %2557 = vmatprep.mubr.msk.f32.mxu1 %vm3190_vm0, %v3189_v5  ;;  %2737 = vmatpush3.msra.mxu1 %v3240_v10  ;;  %v3558_v49 = vsub.f32 %v2071_v32, %v2071_v32 }
  0x81   :  { %v3560_v52 = vpop.permute.xlu1 %49  ;;  %v3562_v53 = vpop.permute.xlu0 %43  ;;  %2738 = vmatprep.subr.mxu1 %v3189_v5 }
  0x82   :  { %5053 = vst [vmem:[#allocation9_spill] sm:$0xff] %v3560_v52  ;;  %5054 = vst [vmem:[#allocation10_spill] sm:$0xff] %v3562_v53  ;;  %vm117_vm3 = vcmp.eq.s32.totalorder %v3560_v52, %v3531_v8  ;;  %vm115_vm4 = vcmp.eq.s32.totalorder %v3562_v53, %v3531_v8  ;;  %v4966_v55 = vand.u32 4294901760, %v3553_v41  ;;  %2739 = vmatpush3.msra.mxu1 %v3242_v11  ;;  %v4963_v45 = vand.u32 4294901760, %v3558_v49 }
  0x83   :  { %v2072_v61 = vsel %vm117_vm3, 1.0, %v3189_v5  ;;  %v2070_v3 = vsel %vm115_vm4, 1.0, %v3189_v5  ;;  %2558 = vmatmul.mubr.msk.f32.gmra.mxu1 %vm115_vm4, %v4968_v35  ;;  %2740 = vmatprep.subr.mxu1 %v3189_v5 }
  0x84   :  { %v3584_v4 = vsub.f32 %v2070_v3, %v2070_v3  ;;  %2560 = vmatprep.mubr.msk.f32.mxu1 %vm3190_vm0, %v3189_v5  ;;  %v289_v6 = vsub.f32 %v3553_v41, %v4966_v55  ;;  %2741 = vmatpush3.msra.mxu1 %v3253_v15  ;;  %v3597_v31 = vsub.f32 %v2072_v61, %v2072_v61 }
  0x85   :  { %v3591_v32 = vpop.permute.xlu1 %55  ;;  %v3593_v34 = vpop.permute.xlu0 %52  ;;  %2742 = vmatprep.subr.mxu1 %v3189_v5 }
  0x86   :  { %5055 = vst [vmem:[#allocation11_spill] sm:$0xff] %v3591_v32  ;;  %5056 = vst [vmem:[#allocation12_spill] sm:$0xff] %v3593_v34  ;;  %vm118_vm5 = vcmp.eq.s32.totalorder %v3593_v34, %v3531_v8  ;;  %v290_v3 = vand.u32 4294901760, %v289_v6  ;;  %v4965_v9 = vand.u32 4294901760, %v3584_v4  ;;  %vm119_vm6 = vcmp.eq.s32.totalorder %v3591_v32, %v3531_v8  ;;  %2743 = vmatpush3.msra.mxu1 %v3255_v16 }
  0x87   :  { %v2073_v63 = vsel %vm118_vm5, 1.0, %v3189_v5  ;;  %2561 = vmatmul.mubr.msk.f32.gmra.mxu1 %vm116_vm1, %v4968_v35  ;;  %v4960_v33 = vand.u32 4294901760, %v3597_v31  ;;  %v2074_v12 = vsel %vm119_vm6, 1.0, %v3189_v5  ;;  %2744 = vmatprep.subr.mxu1 %v3189_v5 }
  0x88   :  { %2448 = vmatmul.mubr.f32.vlgmr.msra.gmra.mxu0 %v290_v3  ;;  %2563 = vmatprep.mubr.msk.f32.mxu1 %vm3190_vm0, %v3189_v5  ;;  %v299_v61 = vsub.f32 %v3584_v4, %v4965_v9  ;;  %v3623_v56 = vsub.f32 %v2073_v63, %v2073_v63  ;;  %v309_v3 = vsub.f32 %v3558_v49, %v4963_v45 }
  0x89   :  { %2630 = vmatpush3.msra.mxu0 %v3269_v21  ;;  %v3619_v6 = vpop.permute.xlu0 %58  ;;  %2450 = vmatprep.mubr.msk.f32.mxu0 %vm3190_vm0, %v3189_v5  ;;  %v3644_v63 = vpop.permute.xlu1 %61  ;;  %v319_v59 = vsub.f32 %v3597_v31, %v4960_v33 }
  0x8a   :  { %5057 = vst [vmem:[#allocation13_spill] sm:$0xff] %v3619_v6  ;;  %v300_v44 = vand.u32 4294901760, %v299_v61  ;;  %2631 = vmatprep.subr.mxu0 %v3189_v5  ;;  %vm120_vm7 = vcmp.eq.s32.totalorder %v3619_v6, %v3531_v8  ;;  %5058 = vst [vmem:[#allocation14_spill] sm:$0xff] %v3644_v63  ;;  %v3649_v61 = vsub.f32 %v2074_v12, %v2074_v12  ;;  %v310_v0 = vand.u32 4294901760, %v309_v3 }
  0x8b   :  { %2564 = vmatmul.mubr.msk.f32.gmra.mxu1 %vm117_vm3, %v4968_v35  ;;  %2632 = vmatpush3.msra.mxu0 %v3272_v22  ;;  %v2075_v50 = vsel %vm120_vm7, 1.0, %v3189_v5  ;;  %vm121_vm8 = vcmp.eq.s32.totalorder %v3644_v63, %v3531_v8  ;;  %v320_v42 = vand.u32 4294901760, %v319_v59  ;;  %v5064_v63 = vmov 1.0  }
  0x8c   :  { %2451 = vmatmul.mubr.f32.gmra.mxu0 %v300_v44  ;;  %2566 = vmatprep.mubr.msk.f32.mxu1 %vm3190_vm0, %v3189_v5  ;;  %v4958_v44 = vand.u32 4294901760, %v3623_v56  ;;  %v3675_v3 = vsub.f32 %v2075_v50, %v2075_v50  ;;  %v4961_v30 = vand.u32 4294901760, %v3649_v61 }
  0x8d   :  { %2453 = vmatprep.mubr.msk.f32.mxu0 %vm3190_vm0, %v3189_v5  ;;  %2633 = vmatprep.subr.mxu0 %v3189_v5  ;;  %v3670_v12 = vpop.permute.xlu0 %64  ;;  %v3696_v50 = vpop.permute.xlu1 %67 }
  0x8e   :  { %2634 = vmatpush3.msra.mxu0 %v3276_v23  ;;  %5059 = vst [vmem:[#allocation15_spill] sm:$0xff] %v3670_v12  ;;  %v329_v36 = vsub.f32 %v3623_v56, %v4958_v44  ;;  %2745 = vmatpush3.msra.mxu1 %v3257_v17  ;;  %vm122_vm9 = vcmp.eq.s32.totalorder %v3670_v12, %v3531_v8  ;;  %5060 = vst [vmem:[#allocation16_spill] sm:$0xff] %v3696_v50  ;;  %v4964_v33 = vand.u32 4294901760, %v3675_v3 }
  0x8f   :  { %2567 = vmatmul.mubr.msk.f32.gmra.mxu1 %vm118_vm5, %v4968_v35  ;;  %2635 = vmatprep.subr.mxu0 %v3189_v5  ;;  %v339_v28 = vsub.f32 %v3649_v61, %v4961_v30  ;;  %vm123_vm10 = vcmp.eq.s32.totalorder %v3696_v50, %v3531_v8 }
  0x90   :  { %2454 = vmatmul.mubr.f32.gmra.mxu0 %v310_v0  ;;  %2569 = vmatprep.mubr.msk.f32.mxu1 %vm3190_vm0, %v3189_v5  ;;  %v2076_v0 = vsel %vm121_vm8, 1.0, %v3189_v5  ;;  %v330_v44 = vand.u32 4294901760, %v329_v36  ;;  %v349_v27 = vsub.f32 %v3675_v3, %v4964_v33 }
  0x91   :  { %2456 = vmatprep.mubr.msk.f32.mxu0 %vm3190_vm0, %v3189_v5  ;;  %2636 = vmatpush3.msra.mxu0 %v3279_v24  ;;  %v3701_v59 = vsub.f32 %v2076_v0, %v2076_v0  ;;  %v3722_v36 = vpop.permute.xlu0 %70  ;;  %v340_v30 = vand.u32 4294901760, %v339_v28  ;;  %v3748_v28 = vpop.permute.xlu1 %73 }
  0x92   :  { %2637 = vmatprep.subr.mxu0 %v3189_v5  ;;  %2746 = vmatprep.subr.mxu1 %v3189_v5  ;;  %5061 = vst [vmem:[#allocation17_spill] sm:$0xff] %v3722_v36  ;;  %vm124_vm11 = vcmp.eq.s32.totalorder %v3722_v36, %v3531_v8  ;;  %5062 = vst [vmem:[#allocation18_spill] sm:$0xff] %v3748_v28  ;;  %v350_v33 = vand.u32 4294901760, %v349_v27  ;;  %vm4989_vm12 = vcmp.eq.s32.totalorder %v3748_v28, %v3531_v8 }
  0x93   :  { %2570 = vmatmul.mubr.msk.f32.gmra.mxu1 %vm119_vm6, %v4968_v35  ;;  %2638 = vmatpush3.msra.mxu0 %v3290_v29  ;;  %v4967_v45 = vand.u32 4294901760, %v3701_v59 }
  0x94   :  { %2457 = vmatmul.mubr.f32.gmra.mxu0 %v320_v42  ;;  %2572 = vmatprep.mubr.msk.f32.mxu1 %vm3190_vm0, %v3189_v5  ;;  %v2077_v42 = vsel %vm122_vm9, 1.0, %v3189_v5 }
  0x95   :  { %2459 = vmatprep.mubr.msk.f32.mxu0 %vm3190_vm0, %v3189_v5  ;;  %2639 = vmatprep.subr.mxu0 %v3189_v5  ;;  %v3727_v0 = vsub.f32 %v2077_v42, %v2077_v42  ;;  %v359_v9 = vsub.f32 %v3701_v59, %v4967_v45  ;;  %v3774_v27 = vpop.permute.xlu0 %76 }
  0x96   :  { %2640 = vmatpush3.msra.mxu0 %v3317_v39  ;;  %2747 = vmatpush3.msra.mxu1 %v3282_v25  ;;  %5063 = vst [vmem:[#allocation19_spill] sm:$0xff] %v3774_v27  ;;  %vm4995_vm13 = vcmp.eq.s32.totalorder %v3774_v27, %v3531_v8 }
  0x97   :  { %2573 = vmatmul.mubr.msk.f32.gmra.mxu1 %vm120_vm7, %v4968_v35  ;;  %2641 = vmatprep.subr.mxu0 %v3189_v5  ;;  %v4974_v55 = vand.u32 4294901760, %v3727_v0  ;;  %v360_v45 = vand.u32 4294901760, %v359_v9  ;;  %v3800_v9 = vpop.permute.xlu1 %79 }
  0x98   :  { %2460 = vmatmul.mubr.f32.gmra.mxu0 %v330_v44  ;;  %2575 = vmatprep.mubr.msk.f32.mxu1 %vm3190_vm0, %v3189_v5  ;;  %v2078_v44 = vsel %vm123_vm10, 1.0, %v3189_v5  ;;  %5065 = vst [vmem:[#allocation20_spill] sm:$0xff] %v3800_v9  ;;  %vm5001_vm14 = vcmp.eq.s32.totalorder %v3800_v9, %v3531_v8 }
  0x99   :  { %2462 = vmatprep.mubr.msk.f32.mxu0 %vm3190_vm0, %v3189_v5  ;;  %2642 = vmatpush3.msra.mxu0 %v3337_v48  ;;  %v3753_v42 = vsub.f32 %v2078_v44, %v2078_v44 }
  0x9a   :  { %2748 = vmatprep.subr.mxu1 %v3189_v5  ;;  %2643 = vmatprep.subr.mxu0 %v3189_v5 }
  0x9b   :  { %2576 = vmatmul.mubr.msk.f32.gmra.mxu1 %vm121_vm8, %v4968_v35  ;;  %2644 = vmatpush3.msra.mxu0 %v3352_v54  ;;  %v4979_v12 = vand.u32 4294901760, %v3753_v42 }
  0x9c   :  { %2463 = vmatmul.mubr.f32.gmra.mxu0 %v340_v30  ;;  %2578 = vmatprep.mubr.msk.f32.mxu1 %vm3190_vm0, %v3189_v5  ;;  %v2079_v30 = vsel %vm124_vm11, 1.0, %v3189_v5 }
  0x9d   :  { %2465 = vmatprep.mubr.msk.f32.mxu0 %vm3190_vm0, %v3189_v5  ;;  %2749 = vmatpush3.msra.mxu1 %v3311_v37  ;;  %v3779_v44 = vsub.f32 %v2079_v30, %v2079_v30  ;;  %v379_v50 = vsub.f32 %v3753_v42, %v4979_v12 }
  0x9e   :  { %2750 = vmatprep.subr.mxu1 %v3189_v5  ;;  %2645 = vmatprep.subr.mxu0 %v3189_v5 }
  0x9f   :  { %2579 = vmatmul.mubr.msk.f32.gmra.mxu1 %vm122_vm9, %v4968_v35  ;;  %v369_v35 = vsub.f32 %v3727_v0, %v4974_v55  ;;  %2646 = vmatpush3.msra.mxu0 %v3373_v62  ;;  %v4984_v6 = vand.u32 4294901760, %v3779_v44  ;;  %v380_v12 = vand.u32 4294901760, %v379_v50  ;;  %v3852_v50 = vpop.permute.xlu1 %85 }
  0xa0   :  { %2466 = vmatmul.mubr.f32.gmra.mxu0 %v350_v33  ;;  %2581 = vmatprep.mubr.msk.f32.mxu1 %vm3190_vm0, %v3189_v5  ;;  %v2080_v33 = vsel %vm4989_vm12, 1.0, %v3189_v5  ;;  %5067 = vst [vmem:[#allocation22_spill] sm:$0xff] %v3852_v50 }
  0xa1   :  { %2468 = vmatprep.mubr.msk.f32.mxu0 %vm3190_vm0, %v3189_v5  ;;  %2751 = vmatpush3.msra.mxu1 %v3322_v43  ;;  %v3805_v30 = vsub.f32 %v2080_v33, %v2080_v33  ;;  %v370_v55 = vand.u32 4294901760, %v369_v35  ;;  %v3826_v35 = vpop.permute.xlu0 %82  ;;  %v389_v36 = vsub.f32 %v3779_v44, %v4984_v6 }
  0xa2   :  { %2752 = vmatprep.subr.mxu1 %v3189_v5  ;;  %2647 = vmatprep.subr.mxu0 %v3189_v5  ;;  %5066 = vst [vmem:[#allocation21_spill] sm:$0xff] %v3826_v35  ;;  %vm5007_vm15 = vcmp.eq.s32.totalorder %v3826_v35, %v3531_v8 }
  0xa3   :  { %2582 = vmatmul.mubr.msk.f32.gmra.mxu1 %vm123_vm10, %v5064_v63  ;;  %2648 = vmatpush3.msra.mxu0 %v3394_v7  ;;  %v4990_v32 = vand.u32 4294901760, %v3805_v30  ;;  %v390_v6 = vand.u32 4294901760, %v389_v36 }
  0xa4   :  { %2469 = vmatmul.mubr.f32.gmra.mxu0 %v360_v45  ;;  %2584 = vmatprep.mubr.msk.f32.mxu1 %vm3190_vm0, %v3189_v5  ;;  %v2081_v45 = vsel %vm4995_vm13, 1.0, %v3189_v5 }
  0xa5   :  { %2471 = vmatprep.mubr.msk.f32.mxu0 %vm3190_vm0, %v3189_v5  ;;  %2753 = vmatpush3.msra.mxu1 %v3343_v51  ;;  %v3831_v33 = vsub.f32 %v2081_v45, %v2081_v45  ;;  %v399_v28 = vsub.f32 %v3805_v30, %v4990_v32  ;;  %v3878_v36 = vpop.permute.xlu0 %88 }
  0xa6   :  { %2754 = vmatprep.subr.mxu1 %v3189_v5  ;;  %2649 = vmatprep.subr.mxu0 %v3189_v5  ;;  %5068 = vst [vmem:[#allocation23_spill] sm:$0xff] %v3878_v36 }
  0xa7   :  { %2585 = vmatmul.mubr.msk.f32.gmra.mxu1 %vm124_vm11, %v5064_v63  ;;  %2650 = vmatpush3.msra.mxu0 %v3409_v18  ;;  %v4996_v34 = vand.u32 4294901760, %v3831_v33  ;;  %v400_v32 = vand.u32 4294901760, %v399_v28  ;;  %v3904_v28 = vpop.permute.xlu1 %91 }
  0xa8   :  { %2472 = vmatmul.mubr.f32.gmra.mxu0 %v370_v55  ;;  %2587 = vmatprep.mubr.msk.f32.mxu1 %vm3190_vm0, %v3189_v5  ;;  %v2082_v55 = vsel %vm5001_vm14, 1.0, %v3189_v5  ;;  %5069 = vst [vmem:[#allocation24_spill] sm:$0xff] %v3904_v28 }
  0xa9   :  { %2474 = vmatprep.mubr.msk.f32.mxu0 %vm3190_vm0, %v3189_v5  ;;  %2755 = vmatpush3.msra.mxu1 %v3367_v60  ;;  %v3857_v45 = vsub.f32 %v2082_v55, %v2082_v55  ;;  %v409_v27 = vsub.f32 %v3831_v33, %v4996_v34 }
  0xaa   :  { %2756 = vmatprep.subr.mxu1 %v3189_v5  ;;  %2651 = vmatprep.subr.mxu0 %v3189_v5 }
  0xab   :  { %2588 = vmatmul.mubr.msk.f32.gmra.mxu1 %vm4989_vm12, %v5064_v63  ;;  %2652 = vmatpush3.msra.mxu0 %v3433_v38  ;;  %vm5013_vm12 = vcmp.eq.s32.totalorder %v3852_v50, %v3531_v8  ;;  %v5002_v52 = vand.u32 4294901760, %v3857_v45  ;;  %v410_v34 = vand.u32 4294901760, %v409_v27  ;;  %v3930_v27 = vpop.permute.xlu0 %94 }
  0xac   :  { %2475 = vmatmul.mubr.f32.gmra.mxu0 %v380_v12  ;;  %2590 = vmatprep.mubr.msk.f32.mxu1 %vm3190_vm0, %v3189_v5  ;;  %v2083_v12 = vsel %vm5007_vm15, 1.0, %v3189_v5  ;;  %5070 = vst [vmem:[#allocation25_spill] sm:$0xff] %v3930_v27 }
  0xad   :  { %2477 = vmatprep.mubr.msk.f32.mxu0 %vm3190_vm0, %v3189_v5  ;;  %2757 = vmatpush3.msra.mxu1 %v3379_v1  ;;  %v3883_v55 = vsub.f32 %v2083_v12, %v2083_v12  ;;  %v419_v9 = vsub.f32 %v3857_v45, %v5002_v52 }
  0xae   :  { %2758 = vmatprep.subr.mxu1 %v3189_v5  ;;  %2653 = vmatprep.subr.mxu0 %v3189_v5 }
  0xaf   :  { %2591 = vmatmul.mubr.msk.f32.gmra.mxu1 %vm4995_vm13, %v5064_v63  ;;  %2654 = vmatpush3.msra.mxu0 %v3445_v46  ;;  %vm5018_vm13 = vcmp.eq.s32.totalorder %v3878_v36, %v3531_v8  ;;  %v5008_v19 = vand.u32 4294901760, %v3883_v55  ;;  %v420_v52 = vand.u32 4294901760, %v419_v9  ;;  %v3956_v9 = vpop.permute.xlu1 %97 }
  0xb0   :  { %2478 = vmatmul.mubr.f32.gmra.mxu0 %v390_v6  ;;  %2593 = vmatprep.mubr.msk.f32.mxu1 %vm3190_vm0, %v3189_v5  ;;  %v2084_v6 = vsel %vm5013_vm12, 1.0, %v3189_v5  ;;  %5071 = vst [vmem:[#allocation26_spill] sm:$0xff] %v3956_v9 }
  0xb1   :  { %2480 = vmatprep.mubr.msk.f32.mxu0 %vm3190_vm0, %v3189_v5  ;;  %2759 = vmatpush3.msra.mxu1 %v3403_v13  ;;  %v3909_v12 = vsub.f32 %v2084_v6, %v2084_v6  ;;  %v429_v35 = vsub.f32 %v3883_v55, %v5008_v19 }
  0xb2   :  { %2760 = vmatprep.subr.mxu1 %v3189_v5  ;;  %2655 = vmatprep.subr.mxu0 %v3189_v5 }
  0xb3   :  { %2594 = vmatmul.mubr.msk.f32.gmra.mxu1 %vm5001_vm14, %v5064_v63  ;;  %2656 = vmatpush3.msra.mxu0 %v3462_v57  ;;  %vm5023_vm14 = vcmp.eq.s32.totalorder %v3904_v28, %v3531_v8  ;;  %v5014_v53 = vand.u32 4294901760, %v3909_v12  ;;  %v430_v19 = vand.u32 4294901760, %v429_v35  ;;  %v3982_v35 = vpop.permute.xlu0 %100 }
  0xb4   :  { %2481 = vmatmul.mubr.f32.gmra.mxu0 %v400_v32  ;;  %2596 = vmatprep.mubr.msk.f32.mxu1 %vm3190_vm0, %v3189_v5  ;;  %v2085_v32 = vsel %vm5018_vm13, 1.0, %v3189_v5  ;;  %5073 = vst [vmem:[#allocation28_spill] sm:$0xff] %v3982_v35 }
  0xb5   :  { %2483 = vmatprep.mubr.msk.f32.mxu0 %vm3190_vm0, %v3189_v5  ;;  %2761 = vmatpush3.msra.mxu1 %v3415_v20  ;;  %v3935_v6 = vsub.f32 %v2085_v32, %v2085_v32  ;;  %v439_v50 = vsub.f32 %v3909_v12, %v5014_v53 }
  0xb6   :  { %2762 = vmatprep.subr.mxu1 %v3189_v5  ;;  %2657 = vmatprep.subr.mxu0 %v3189_v5 }
  0xb7   :  { %2597 = vmatmul.mubr.msk.f32.gmra.mxu1 %vm5007_vm15, %v5064_v63  ;;  %2658 = vmatpush3.msra.mxu0 %v3473_v2  ;;  %vm5029_vm15 = vcmp.eq.s32.totalorder %v3930_v27, %v3531_v8  ;;  %v5019_v26 = vand.u32 4294901760, %v3935_v6  ;;  %v440_v53 = vand.u32 4294901760, %v439_v50  ;;  %v4006_v50 = vpop.permute.xlu1 %103 }
  0xb8   :  { %2484 = vmatmul.mubr.f32.gmra.mxu0 %v410_v34  ;;  %2599 = vmatprep.mubr.msk.f32.mxu1 %vm3190_vm0, %v3189_v5  ;;  %v2086_v34 = vsel %vm5023_vm14, 1.0, %v3189_v5  ;;  %5075 = vst [vmem:[#allocation30_spill] sm:$0xff] %v4006_v50 }
  0xb9   :  { %2486 = vmatprep.mubr.msk.f32.mxu0 %vm3190_vm0, %v3189_v5  ;;  %2763 = vmatpush3.msra.mxu1 %v3436_v40  ;;  %v3961_v32 = vsub.f32 %v2086_v34, %v2086_v34  ;;  %v449_v36 = vsub.f32 %v3935_v6, %v5019_v26 }
  0xba   :  { %2764 = vmatprep.subr.mxu1 %v3189_v5  ;;  %2659 = vmatprep.subr.mxu0 %v3189_v5 }
  0xbb   :  { %2600 = vmatmul.mubr.msk.f32.gmra.mxu1 %vm5013_vm12, %v5064_v63  ;;  %5072 = vst [vmem:[#allocation27_spill] sm:$0xff] %v3961_v32  ;;  %2660 = vmatpush3.msra.mxu0 %v3489_v14  ;;  %vm5035_vm12 = vcmp.eq.s32.totalorder %v3956_v9, %v3531_v8  ;;  %v5024_v14 = vand.u32 4294901760, %v3961_v32  ;;  %v450_v26 = vand.u32 4294901760, %v449_v36  ;;  %v4028_v36 = vpop.permute.xlu0 %106 }
  0xbc   :  { %2487 = vmatmul.mubr.f32.gmra.mxu0 %v420_v52  ;;  %2602 = vmatprep.mubr.msk.f32.mxu1 %vm3190_vm0, %v3189_v5  ;;  %v2087_v52 = vsel %vm5029_vm15, 1.0, %v3189_v5 }
  0xbd   :  { %2489 = vmatprep.mubr.msk.f32.mxu0 %vm3190_vm0, %v3189_v5  ;;  %2765 = vmatpush3.msra.mxu1 %v3447_v47  ;;  %v3987_v34 = vsub.f32 %v2087_v52, %v2087_v52  ;;  %v459_v28 = vsub.f32 %v3961_v32, %v5024_v14 }
  0xbe   :  { %2766 = vmatprep.subr.mxu1 %v3189_v5  ;;  %2843 = vmatprep.subr.mxu0 %v3189_v5 }
  0xbf   :  { %2603 = vmatmul.mubr.msk.f32.gmra.mxu1 %vm5018_vm13, %v5064_v63  ;;  %5074 = vst [vmem:[#allocation29_spill] sm:$0xff] %v3987_v34  ;;  %vm5041_vm13 = vcmp.eq.s32.totalorder %v3982_v35, %v3531_v8  ;;  %v460_v14 = vand.u32 4294901760, %v459_v28  ;;  %v4050_v28 = vpop.permute.xlu1 %109 }
  0xc0   :  { %2490 = vmatmul.mubr.f32.gmra.mxu0 %v430_v19  ;;  %2605 = vmatprep.mubr.msk.f32.mxu1 %vm3190_vm0, %v3189_v5  ;;  %v2088_v19 = vsel %vm5035_vm12, 1.0, %v3189_v5 }
  0xc1   :  { %2492 = vmatprep.mubr.msk.f32.mxu0 %vm3190_vm0, %v3189_v5  ;;  %2767 = vmatpush3.msra.mxu1 %v3465_v58  ;;  %v4010_v52 = vsub.f32 %v2088_v19, %v2088_v19  ;;  %v5030_v58 = vand.u32 4294901760, %v3987_v34 }
  0xc2   :  { %2950 = vmatprep.subr.mxu1 %v3189_v5 }
  0xc3   :  { %2606 = vmatmul.mubr.msk.f32.gmra.mxu1 %vm5023_vm14, %v5064_v63  ;;  %5076 = vst [vmem:[#allocation31_spill] sm:$0xff] %v4010_v52  ;;  %vm135_vm14 = vcmp.eq.s32.totalorder %v4006_v50, %v3531_v8  ;;  %v469_v27 = vsub.f32 %v3987_v34, %v5030_v58  ;;  %v5036_v32 = vand.u32 4294901760, %v4010_v52 }
  0xc4   :  { %2493 = vmatmul.mubr.f32.gmra.mxu0 %v440_v53  ;;  %2608 = vmatprep.mubr.msk.f32.mxu1 %vm3190_vm0, %v3189_v5  ;;  %v2089_v53 = vsel %vm5041_vm13, 1.0, %v3189_v5 }
  0xc5   :  { %2495 = vmatprep.mubr.msk.f32.mxu0 %vm3190_vm0, %v3189_v5  ;;  %v4032_v19 = vsub.f32 %v2089_v53, %v2089_v53  ;;  %v470_v58 = vand.u32 4294901760, %v469_v27  ;;  %v479_v9 = vsub.f32 %v4010_v52, %v5036_v32  ;;  %v4072_v27 = vpop.permute.xlu0 %112 }
  0xc7   :  { %2609 = vmatmul.mubr.msk.f32.gmra.mxu1 %vm5029_vm15, %v5064_v63  ;;  %vm136_vm15 = vcmp.eq.s32.totalorder %v4028_v36, %v3531_v8  ;;  %v5042_v34 = vand.u32 4294901760, %v4032_v19  ;;  %v480_v32 = vand.u32 4294901760, %v479_v9 }
  0xc8   :  { %2496 = vmatmul.mubr.f32.gmra.mxu0 %v450_v26  ;;  %2611 = vmatprep.mubr.msk.f32.mxu1 %vm3190_vm0, %v3189_v5  ;;  %v2090_v26 = vsel %vm135_vm14, 1.0, %v3189_v5 }
  0xc9   :  { %2498 = vmatprep.mubr.msk.f32.mxu0 %vm3190_vm0, %v3189_v5  ;;  %v4054_v53 = vsub.f32 %v2090_v26, %v2090_v26  ;;  %v489_v35 = vsub.f32 %v4032_v19, %v5042_v34 }
  0xcb   :  { %2612 = vmatmul.mubr.msk.f32.gmra.mxu1 %vm5035_vm12, %v5064_v63  ;;  %5077 = vst [vmem:[#allocation32_spill] sm:$0xff] %v4054_v53  ;;  %vm137_vm12 = vcmp.eq.s32.totalorder %v4050_v28, %v3531_v8  ;;  %v5045_v52 = vand.u32 4294901760, %v4054_v53 }
  0xcc   :  { %2499 = vmatmul.mubr.f32.gmra.mxu0 %v460_v14  ;;  %2614 = vmatprep.mubr.msk.f32.mxu1 %vm3190_vm0, %v3189_v5  ;;  %v2091_v14 = vsel %vm136_vm15, 1.0, %v3189_v5 }
  0xcd   :  { %2501 = vmatprep.mubr.msk.f32.mxu0 %vm3190_vm0, %v3189_v5  ;;  %v4076_v26 = vsub.f32 %v2091_v14, %v2091_v14  ;;  %v490_v14 = vand.u32 4294901760, %v489_v35  ;;  %v499_v34 = vsub.f32 %v4054_v53, %v5045_v52 }
  0xcf   :  { %2615 = vmatmul.mubr.msk.f32.gmra.mxu1 %vm5041_vm13, %v5064_v63  ;;  %vm138_vm13 = vcmp.eq.s32.totalorder %v4072_v27, %v3531_v8  ;;  %v508_v50 = vand.u32 4294901760, %v4076_v26 }
  0xd0   :  { %2502 = vmatmul.mubr.f32.gmra.mxu0 %v470_v58  ;;  %2617 = vmatprep.mubr.msk.f32.mxu1 %vm3190_vm0, %v3189_v5  ;;  %v2092_v58 = vsel %vm137_vm12, 1.0, %v3189_v5 }
  0xd1   :  { %2504 = vmatprep.mubr.msk.f32.mxu0 %vm3190_vm0, %v3189_v5  ;;  %v4096_v9 = vsub.f32 %v2092_v58, %v2092_v58  ;;  %v500_v58 = vand.u32 4294901760, %v499_v34  ;;  %v509_v52 = vsub.f32 %v4076_v26, %v508_v50 }
  0xd3   :  { %2618 = vmatmul.mubr.msk.f32.gmra.mxu1 %vm135_vm14, %v5064_v63  ;;  %v5048_v53 = vand.u32 4294901760, %v4096_v9 }
  0xd4   :  { %2505 = vmatmul.mubr.f32.gmra.mxu0 %v480_v32  ;;  %2620 = vmatprep.mubr.msk.f32.mxu1 %vm3190_vm0, %v3189_v5  ;;  %v2093_v32 = vsel %vm138_vm13, 1.0, %v3189_v5 }
  0xd5   :  { %2507 = vmatprep.mubr.msk.f32.mxu0 %vm3190_vm0, %v3189_v5  ;;  %v4114_v35 = vsub.f32 %v2093_v32, %v2093_v32  ;;  %v519_v34 = vsub.f32 %v4096_v9, %v5048_v53  ;;  %v5078_v53 = vand.u32 4294901760, %v3553_v41 }
  0xd7   :  { %2621 = vmatmul.mubr.msk.f32.gmra.mxu1 %vm136_vm15, %v5064_v63  ;;  %v528_v32 = vand.u32 4294901760, %v4114_v35 }
  0xd8   :  { %2508 = vmatmul.mubr.f32.gmra.mxu0 %v490_v14  ;;  %2623 = vmatprep.mubr.msk.f32.mxu1 %vm3190_vm0, %v3189_v5  ;;  %v510_v14 = vand.u32 4294901760, %v509_v52 }
  0xd9   :  { %2510 = vmatprep.mubr.msk.f32.mxu0 %vm3190_vm0, %v3189_v5  ;;  %v529_v52 = vsub.f32 %v4114_v35, %v528_v32 }
  0xdb   :  { %2624 = vmatmul.mubr.msk.f32.gmra.mxu1 %vm137_vm12, %v5064_v63 }
  0xdc   :  { %2511 = vmatmul.mubr.f32.gmra.mxu0 %v500_v58  ;;  %2626 = vmatprep.mubr.msk.f32.mxu1 %vm3190_vm0, %v3189_v5  ;;  %v520_v58 = vand.u32 4294901760, %v519_v34  ;;  %v5079_v34 = vand.u32 4294901760, %v3584_v4 }
  0xdd   :  { %2513 = vmatprep.mubr.msk.f32.mxu0 %vm3190_vm0, %v3189_v5 }
  0xdf   :  { %2627 = vmatmul.mubr.msk.f32.gmra.mxu1 %vm138_vm13, %v5064_v63 }
  0xe0   :  { %2514 = vmatmul.mubr.f32.gmra.mxu0 %v510_v14  ;;  %2768 = vmatprep.mubr.msk.f32.mxu1 %vm3190_vm0, %v3189_v5  ;;  %v530_v14 = vand.u32 4294901760, %v529_v52 }
  0xe1   :  { %2516 = vmatprep.mubr.msk.f32.mxu0 %vm3190_vm0, %v3189_v5 }
  0xe3   :  { %2769 = vmatmul.mubr.f32.vlgmr.msra.gmra.mxu1 %v5078_v53  ;;  %v5080_v53 = vand.u32 4294901760, %v3558_v49 }
  0xe4   :  { %2517 = vmatmul.mubr.f32.gmra.mxu0 %v520_v58  ;;  %2771 = vmatprep.mubr.msk.f32.mxu1 %vm3190_vm0, %v3189_v5  ;;  %v5083_v58 = vand.u32 4294901760, %v3272_v22  ;;  %v5086_v22 = vand.u32 4294901760, %v3279_v24  ;;  %v5090_v24 = vand.u32 4294901760, %v3317_v39  ;;  %v5094_v39 = vand.u32 4294901760, %v3352_v54 }
  0xe5   :  { %2519 = vmatprep.mubr.msk.f32.mxu0 %vm3190_vm0, %v3189_v5  ;;  %2951 = vmatpush3.msra.mxu1 %v3240_v10  ;;  %v5081_v10 = vand.u32 4294901760, %v3269_v21  ;;  %v5084_v21 = vand.u32 4294901760, %v3276_v23  ;;  %v5087_v23 = vand.u32 4294901760, %v3649_v61  ;;  %v5098_v54 = vand.u32 4294901760, %v3394_v7 }
  0xe6   :  { %2952 = vmatprep.subr.mxu1 %v3189_v5  ;;  %v5102_v7 = vand.u32 4294901760, %v3433_v38  ;;  %v5106_v38 = vand.u32 4294901760, %v3462_v57  ;;  %v5111_v57 = vld [vmem:[#allocation6_spill] sm:$0xff] }
  0xe7   :  { %2772 = vmatmul.mubr.f32.gmra.mxu1 %v5079_v34 }
  0xe8   :  { %2520 = vmatmul.mubr.f32.gmra.mxu0 %v530_v14  ;;  %2774 = vmatprep.mubr.msk.f32.mxu1 %vm3190_vm0, %v3189_v5 }
  0xe9   :  { %2661 = vmatprep.mubr.msk.f32.mxu0 %vm3190_vm0, %v3189_v5  ;;  %2953 = vmatpush3.msra.mxu1 %v3242_v11  ;;  %v5082_v11 = vand.u32 4294901760, %v3597_v31 }
  0xea   :  { %2954 = vmatprep.subr.mxu1 %v3189_v5 }
  0xeb   :  { %2775 = vmatmul.mubr.f32.gmra.mxu1 %v5080_v53 }
  0xec   :  { %2662 = vmatmul.mubr.f32.vlgmr.msra.gmra.mxu0 %v3553_v41  ;;  %2777 = vmatprep.mubr.msk.f32.mxu1 %vm3190_vm0, %v3189_v5  ;;  %v5088_v41 = vand.u32 4294901760, %v3290_v29  ;;  %v5092_v29 = vand.u32 4294901760, %v3337_v48  ;;  %v5096_v48 = vand.u32 4294901760, %v3373_v62  ;;  %v5100_v62 = vand.u32 4294901760, %v3409_v18 }
  0xed   :  { %2844 = vmatpush3.msra.mxu0 %v5081_v10  ;;  %2664 = vmatprep.mubr.msk.f32.mxu0 %vm3190_vm0, %v3189_v5  ;;  %v5104_v18 = vand.u32 4294901760, %v3445_v46  ;;  %v5108_v46 = vand.u32 4294901760, %v3473_v2  ;;  %v5112_v2 = vand.u32 4294901760, %v5111_v57 }
  0xee   :  { %2845 = vmatprep.subr.mxu0 %v3189_v5  ;;  %2955 = vmatpush3.msra.mxu1 %v3253_v15  ;;  %v5085_v15 = vand.u32 4294901760, %v3623_v56 }
  0xef   :  { %2778 = vmatmul.mubr.f32.gmra.mxu1 %v5082_v11  ;;  %2846 = vmatpush3.msra.mxu0 %v5083_v58 }
  0xf0   :  { %2665 = vmatmul.mubr.f32.gmra.mxu0 %v3584_v4  ;;  %2780 = vmatprep.mubr.msk.f32.mxu1 %vm3190_vm0, %v3189_v5 }
  0xf1   :  { %2667 = vmatprep.mubr.msk.f32.mxu0 %vm3190_vm0, %v3189_v5  ;;  %2847 = vmatprep.subr.mxu0 %v3189_v5 }
  0xf2   :  { %2848 = vmatpush3.msra.mxu0 %v5084_v21  ;;  %2956 = vmatprep.subr.mxu1 %v3189_v5 }
  0xf3   :  { %2781 = vmatmul.mubr.f32.gmra.mxu1 %v5085_v15  ;;  %2849 = vmatprep.subr.mxu0 %v3189_v5 }
  0xf4   :  { %2668 = vmatmul.mubr.f32.gmra.mxu0 %v3558_v49  ;;  %2783 = vmatprep.mubr.msk.f32.mxu1 %vm3190_vm0, %v3189_v5  ;;  %v5115_v49 = vld [vmem:[#allocation29_spill] sm:$0xff] }
  0xf5   :  { %2670 = vmatprep.mubr.msk.f32.mxu0 %vm3190_vm0, %v3189_v5  ;;  %2850 = vmatpush3.msra.mxu0 %v5086_v22  ;;  %v5116_v4 = vand.u32 4294901760, %v5115_v49 }
  0xf6   :  { %2957 = vmatpush3.msra.mxu1 %v3255_v16  ;;  %2851 = vmatprep.subr.mxu0 %v3189_v5  ;;  %v5089_v16 = vand.u32 4294901760, %v3675_v3 }
  0xf7   :  { %2784 = vmatmul.mubr.f32.gmra.mxu1 %v5087_v23  ;;  %2852 = vmatpush3.msra.mxu0 %v5088_v41 }
  0xf8   :  { %2671 = vmatmul.mubr.f32.gmra.mxu0 %v3597_v31  ;;  %2786 = vmatprep.mubr.msk.f32.mxu1 %vm3190_vm0, %v3189_v5 }
  0xf9   :  { %2673 = vmatprep.mubr.msk.f32.mxu0 %vm3190_vm0, %v3189_v5  ;;  %2958 = vmatprep.subr.mxu1 %v3189_v5 }
  0xfa   :  { %2959 = vmatpush3.msra.mxu1 %v3257_v17  ;;  %2853 = vmatprep.subr.mxu0 %v3189_v5  ;;  %v5091_v17 = vand.u32 4294901760, %v3701_v59 }
  0xfb   :  { %2787 = vmatmul.mubr.f32.gmra.mxu1 %v5089_v16  ;;  %2854 = vmatpush3.msra.mxu0 %v5090_v24 }
  0xfc   :  { %2674 = vmatmul.mubr.f32.gmra.mxu0 %v3623_v56  ;;  %2789 = vmatprep.mubr.msk.f32.mxu1 %vm3190_vm0, %v3189_v5  ;;  %v5110_v56 = vld [vmem:[#allocation5_spill] sm:$0xff] }
  0xfd   :  { %2676 = vmatprep.mubr.msk.f32.mxu0 %vm3190_vm0, %v3189_v5  ;;  %2960 = vmatprep.subr.mxu1 %v3189_v5 }
  0xfe   :  { %2961 = vmatpush3.msra.mxu1 %v3282_v25  ;;  %2855 = vmatprep.subr.mxu0 %v3189_v5  ;;  %v5093_v25 = vand.u32 4294901760, %v3727_v0 }
  0xff   :  { %2790 = vmatmul.mubr.f32.gmra.mxu1 %v5091_v17  ;;  %2856 = vmatpush3.msra.mxu0 %v5092_v29 }
 0x100   :  { %2677 = vmatmul.mubr.f32.gmra.mxu0 %v3649_v61  ;;  %2792 = vmatprep.mubr.msk.f32.mxu1 %vm3190_vm0, %v3189_v5  ;;  %v5117_v61 = vld [vmem:[#allocation31_spill] sm:$0xff] }
 0x101   :  { %2679 = vmatprep.mubr.msk.f32.mxu0 %vm3190_vm0, %v3189_v5  ;;  %2962 = vmatprep.subr.mxu1 %v3189_v5 }
 0x102   :  { %2963 = vmatpush3.msra.mxu1 %v3311_v37  ;;  %2857 = vmatprep.subr.mxu0 %v3189_v5  ;;  %v5095_v37 = vand.u32 4294901760, %v3753_v42 }
 0x103   :  { %2793 = vmatmul.mubr.f32.gmra.mxu1 %v5093_v25  ;;  %2858 = vmatpush3.msra.mxu0 %v5094_v39  ;;  %v5138_v39 = vld [vmem:[#allocation20_spill] sm:$0xff] }
 0x104   :  { %2680 = vmatmul.mubr.f32.gmra.mxu0 %v3675_v3  ;;  %2795 = vmatprep.mubr.msk.f32.mxu1 %vm3190_vm0, %v3189_v5  ;;  %v5118_v3 = vand.u32 4294901760, %v5117_v61 }
 0x105   :  { %2682 = vmatprep.mubr.msk.f32.mxu0 %vm3190_vm0, %v3189_v5  ;;  %2964 = vmatprep.subr.mxu1 %v3189_v5 }
 0x106   :  { %2965 = vmatpush3.msra.mxu1 %v3322_v43  ;;  %2859 = vmatprep.subr.mxu0 %v3189_v5  ;;  %v5097_v43 = vand.u32 4294901760, %v3779_v44 }
 0x107   :  { %2796 = vmatmul.mubr.f32.gmra.mxu1 %v5095_v37  ;;  %2860 = vmatpush3.msra.mxu0 %v5096_v48 }
 0x108   :  { %2683 = vmatmul.mubr.f32.gmra.mxu0 %v3701_v59  ;;  %2798 = vmatprep.mubr.msk.f32.mxu1 %vm3190_vm0, %v3189_v5  ;;  %v5119_v59 = vand.u32 4294901760, %v4032_v19 }
 0x109   :  { %2685 = vmatprep.mubr.msk.f32.mxu0 %vm3190_vm0, %v3189_v5  ;;  %2966 = vmatprep.subr.mxu1 %v3189_v5 }
 0x10a   :  { %2967 = vmatpush3.msra.mxu1 %v3343_v51  ;;  %2861 = vmatprep.subr.mxu0 %v3189_v5  ;;  %v5099_v51 = vand.u32 4294901760, %v3805_v30 }
 0x10b   :  { %2799 = vmatmul.mubr.f32.gmra.mxu1 %v5097_v43  ;;  %2862 = vmatpush3.msra.mxu0 %v5098_v54 }
 0x10c   :  { %2686 = vmatmul.mubr.f32.gmra.mxu0 %v3727_v0  ;;  %2801 = vmatprep.mubr.msk.f32.mxu1 %vm3190_vm0, %v3189_v5  ;;  %v5120_v0 = vld [vmem:[#allocation32_spill] sm:$0xff] }
 0x10d   :  { %2688 = vmatprep.mubr.msk.f32.mxu0 %vm3190_vm0, %v3189_v5  ;;  %2968 = vmatprep.subr.mxu1 %v3189_v5 }
 0x10e   :  { %2969 = vmatpush3.msra.mxu1 %v3367_v60  ;;  %2863 = vmatprep.subr.mxu0 %v3189_v5  ;;  %v5101_v60 = vand.u32 4294901760, %v3831_v33 }
 0x10f   :  { %2802 = vmatmul.mubr.f32.gmra.mxu1 %v5099_v51  ;;  %2864 = vmatpush3.msra.mxu0 %v5100_v62 }
 0x110   :  { %2689 = vmatmul.mubr.f32.gmra.mxu0 %v3753_v42  ;;  %2804 = vmatprep.mubr.msk.f32.mxu1 %vm3190_vm0, %v3189_v5  ;;  %v5121_v42 = vand.u32 4294901760, %v5120_v0 }
 0x111   :  { %2691 = vmatprep.mubr.msk.f32.mxu0 %vm3190_vm0, %v3189_v5  ;;  %2970 = vmatprep.subr.mxu1 %v3189_v5 }
 0x112   :  { %2971 = vmatpush3.msra.mxu1 %v3379_v1  ;;  %2865 = vmatprep.subr.mxu0 %v3189_v5  ;;  %v5103_v1 = vand.u32 4294901760, %v3857_v45 }
 0x113   :  { %2805 = vmatmul.mubr.f32.gmra.mxu1 %v5101_v60  ;;  %2866 = vmatpush3.msra.mxu0 %v5102_v7 }
 0x114   :  { %2692 = vmatmul.mubr.f32.gmra.mxu0 %v3779_v44  ;;  %2807 = vmatprep.mubr.msk.f32.mxu1 %vm3190_vm0, %v3189_v5 }
 0x115   :  { %2694 = vmatprep.mubr.msk.f32.mxu0 %vm3190_vm0, %v3189_v5  ;;  %2972 = vmatprep.subr.mxu1 %v3189_v5 }
 0x116   :  { %2973 = vmatpush3.msra.mxu1 %v3403_v13  ;;  %2867 = vmatprep.subr.mxu0 %v3189_v5  ;;  %v5105_v13 = vand.u32 4294901760, %v3883_v55 }
 0x117   :  { %2808 = vmatmul.mubr.f32.gmra.mxu1 %v5103_v1  ;;  %2868 = vmatpush3.msra.mxu0 %v5104_v18 }
 0x118   :  { %2695 = vmatmul.mubr.f32.gmra.mxu0 %v3805_v30  ;;  %2810 = vmatprep.mubr.msk.f32.mxu1 %vm3190_vm0, %v3189_v5  ;;  %v5122_v30 = vand.u32 4294901760, %v4096_v9 }
 0x119   :  { %2697 = vmatprep.mubr.msk.f32.mxu0 %vm3190_vm0, %v3189_v5  ;;  %2974 = vmatprep.subr.mxu1 %v3189_v5 }
 0x11a   :  { %2975 = vmatpush3.msra.mxu1 %v3415_v20  ;;  %2869 = vmatprep.subr.mxu0 %v3189_v5  ;;  %v5107_v20 = vand.u32 4294901760, %v3909_v12 }
 0x11b   :  { %2811 = vmatmul.mubr.f32.gmra.mxu1 %v5105_v13  ;;  %2870 = vmatpush3.msra.mxu0 %v5106_v38 }
 0x11c   :  { %2698 = vmatmul.mubr.f32.gmra.mxu0 %v3831_v33  ;;  %2813 = vmatprep.mubr.msk.f32.mxu1 %vm3190_vm0, %v3189_v5 }
 0x11d   :  { %2700 = vmatprep.mubr.msk.f32.mxu0 %vm3190_vm0, %v3189_v5  ;;  %2976 = vmatprep.subr.mxu1 %v3189_v5 }
 0x11e   :  { %2977 = vmatpush3.msra.mxu1 %v3436_v40  ;;  %2871 = vmatprep.subr.mxu0 %v3189_v5  ;;  %v5109_v40 = vand.u32 4294901760, %v3935_v6 }
 0x11f   :  { %2814 = vmatmul.mubr.f32.gmra.mxu1 %v5107_v20  ;;  %2978 = vmatprep.subr.mxu1 %v3189_v5 }
 0x120   :  { %2701 = vmatmul.mubr.f32.gmra.mxu0 %v3857_v45  ;;  %2816 = vmatprep.mubr.msk.f32.mxu1 %vm3190_vm0, %v3189_v5 }
 0x121   :  { %2703 = vmatprep.mubr.msk.f32.mxu0 %vm3190_vm0, %v3189_v5  ;;  %2872 = vmatpush3.msra.mxu0 %v5108_v46 }
 0x122   :  { %2979 = vmatpush3.msra.mxu1 %v3447_v47  ;;  %2873 = vmatprep.subr.mxu0 %v3189_v5  ;;  %v5113_v47 = vld [vmem:[#allocation27_spill] sm:$0xff] }
 0x123   :  { %2817 = vmatmul.mubr.f32.gmra.mxu1 %v5109_v40  ;;  %2980 = vmatprep.subr.mxu1 %v3189_v5  ;;  %v5114_v31 = vand.u32 4294901760, %v5113_v47 }
 0x124   :  { %2704 = vmatmul.mubr.f32.gmra.mxu0 %v3883_v55  ;;  %2819 = vmatprep.mubr.msk.f32.mxu1 %vm3190_vm0, %v3189_v5 }
 0x125   :  { %2706 = vmatprep.mubr.msk.f32.mxu0 %vm3190_vm0, %v3189_v5  ;;  %2981 = vmatpush3.msra.mxu1 %v5110_v56 }
 0x126   :  { %2874 = vmatpush3.msra.mxu0 %v5112_v2 }
 0x127   :  { %2820 = vmatmul.mubr.f32.gmra.mxu1 %v5114_v31 }
 0x128   :  { %2707 = vmatmul.mubr.f32.gmra.mxu0 %v3909_v12  ;;  %2822 = vmatprep.mubr.msk.f32.mxu1 %vm3190_vm0, %v3189_v5 }
 0x129   :  { %2709 = vmatprep.mubr.msk.f32.mxu0 %vm3190_vm0, %v3189_v5 }
 0x12b   :  { %2823 = vmatmul.mubr.f32.gmra.mxu1 %v5116_v4 }
 0x12c   :  { %2710 = vmatmul.mubr.f32.gmra.mxu0 %v3935_v6  ;;  %2825 = vmatprep.mubr.msk.f32.mxu1 %vm3190_vm0, %v3189_v5 }
 0x12d   :  { %2712 = vmatprep.mubr.msk.f32.mxu0 %vm3190_vm0, %v3189_v5 }
 0x12f   :  { %2826 = vmatmul.mubr.f32.gmra.mxu1 %v5118_v3 }
 0x130   :  { %2713 = vmatmul.mubr.f32.gmra.mxu0 %v5113_v47  ;;  %2828 = vmatprep.mubr.msk.f32.mxu1 %vm3190_vm0, %v3189_v5 }
 0x131   :  { %2715 = vmatprep.mubr.msk.f32.mxu0 %vm3190_vm0, %v3189_v5 }
 0x133   :  { %2829 = vmatmul.mubr.f32.gmra.mxu1 %v5119_v59 }
 0x134   :  { %2716 = vmatmul.mubr.f32.gmra.mxu0 %v5115_v49  ;;  %2831 = vmatprep.mubr.msk.f32.mxu1 %vm3190_vm0, %v3189_v5 }
 0x135   :  { %2718 = vmatprep.mubr.msk.f32.mxu0 %vm3190_vm0, %v3189_v5 }
 0x137   :  { %2832 = vmatmul.mubr.f32.gmra.mxu1 %v5121_v42 }
 0x138   :  { %2719 = vmatmul.mubr.f32.gmra.mxu0 %v5117_v61  ;;  %2834 = vmatprep.mubr.msk.f32.mxu1 %vm3190_vm0, %v3189_v5 }
 0x139   :  { %2721 = vmatprep.mubr.msk.f32.mxu0 %vm3190_vm0, %v3189_v5 }
 0x13b   :  { %2835 = vmatmul.mubr.f32.gmra.mxu1 %v508_v50 }
 0x13c   :  { %2722 = vmatmul.mubr.f32.gmra.mxu0 %v4032_v19  ;;  %2837 = vmatprep.mubr.msk.f32.mxu1 %vm3190_vm0, %v3189_v5 }
 0x13d   :  { %2724 = vmatprep.mubr.msk.f32.mxu0 %vm3190_vm0, %v3189_v5 }
 0x13f   :  { %v683_v44 = vpop.f32.mrf.mxu1  ;;  %2838 = vmatmul.mubr.f32.gmra.mxu1 %v5122_v30 }
 0x140   :  { %2725 = vmatmul.mubr.f32.gmra.mxu0 %v5120_v0  ;;  %2840 = vmatprep.mubr.msk.f32.mxu1 %vm3190_vm0, %v3189_v5 }
 0x141   :  { %v2556_v33 = vpop.f32.mrf.mxu1  ;;  %2727 = vmatprep.mubr.msk.f32.mxu0 %vm3190_vm0, %v3189_v5 }
 0x143   :  { %v689_v45 = vpop.f32.mrf.mxu1  ;;  %2841 = vmatmul.mubr.f32.gmra.mxu1 %v528_v32 }
 0x144   :  { %2728 = vmatmul.mubr.f32.gmra.mxu0 %v4076_v26  ;;  %2982 = vmatprep.mubr.msk.f32.mxu1 %vm3190_vm0, %v3189_v5 }
 0x145   :  { %v2559_v55 = vpop.f32.mrf.mxu1  ;;  %2730 = vmatprep.mubr.msk.f32.mxu0 %vm3190_vm0, %v3189_v5 }
 0x147   :  { %v695_v12 = vpop.f32.mrf.mxu1  ;;  %2983 = vmatmul.mubr.msk.f32.vlgmr.msra.gmra.mxu1 %vm114_vm2, %v5064_v63 }
 0x148   :  { %v292_v50 = vpop.f32.mrf.mxu0  ;;  %2731 = vmatmul.mubr.f32.gmra.mxu0 %v4096_v9  ;;  %2985 = vmatprep.mubr.msk.f32.mxu1 %vm3190_vm0, %v3189_v5 }
 0x149   :  { %v4401_v19 = vadd.f32 %v683_v44, %v292_v50  ;;  %v2562_v26 = vpop.f32.mrf.mxu1  ;;  %2733 = vmatprep.mubr.msk.f32.mxu0 %vm3190_vm0, %v3189_v5 }
 0x14a   :  { %v2449_v32 = vpop.f32.mrf.mxu0  ;;  %v5153_v26 = vld [vmem:[#allocation25_spill] sm:$0xff] }
 0x14b   :  { %v701_v52 = vpop.f32.mrf.mxu1  ;;  %2986 = vmatmul.mubr.msk.f32.gmra.mxu1 %vm115_vm4, %v5064_v63 }
 0x14c   :  { %v302_v34 = vpop.f32.mrf.mxu0  ;;  %2734 = vmatmul.mubr.f32.gmra.mxu0 %v4114_v35  ;;  %2988 = vmatprep.mubr.msk.f32.mxu1 %vm3190_vm0, %v3189_v5 }
 0x14d   :  { %v4412_v9 = vadd.f32 %v689_v45, %v302_v34  ;;  %v2565_v53 = vpop.f32.mrf.mxu1  ;;  %2875 = vmatprep.mubr.msk.f32.mxu0 %vm3190_vm0, %v3189_v5 }
 0x14e   :  { %v2452_v10 = vpop.f32.mrf.mxu0 }
 0x14f   :  { %v707_v11 = vpop.f32.mrf.mxu1  ;;  %2989 = vmatmul.mubr.msk.f32.gmra.mxu1 %vm116_vm1, %v5064_v63  ;;  %v5134_v10 = vld [vmem:[#allocation18_spill] sm:$0xff] }
 0x150   :  { %v312_v21 = vpop.f32.mrf.mxu0  ;;  %2876 = vmatmul.mubr.msk.f32.vlgmr.msra.gmra.mxu0 %vm114_vm2, %v5064_v63  ;;  %2991 = vmatprep.mubr.msk.f32.mxu1 %vm3190_vm0, %v3189_v5 }
 0x151   :  { %v4426_v35 = vadd.f32 %v695_v12, %v312_v21  ;;  %v2568_v15 = vpop.f32.mrf.mxu1  ;;  %2878 = vmatprep.mubr.msk.f32.mxu0 %vm3190_vm0, %v3189_v5 }
 0x152   :  { %v2455_v22 = vpop.f32.mrf.mxu0 }
 0x153   :  { %v713_v23 = vpop.f32.mrf.mxu1  ;;  %2992 = vmatmul.mubr.msk.f32.gmra.mxu1 %vm117_vm3, %v5064_v63 }
 0x154   :  { %v322_v16 = vpop.f32.mrf.mxu0  ;;  %2879 = vmatmul.mubr.msk.f32.gmra.mxu0 %vm115_vm4, %v5064_v63  ;;  %2994 = vmatprep.mubr.msk.f32.mxu1 %vm3190_vm0, %v3189_v5 }
 0x155   :  { %v4440_v24 = vadd.f32 %v701_v52, %v322_v16  ;;  %v2571_v17 = vpop.f32.mrf.mxu1  ;;  %2881 = vmatprep.mubr.msk.f32.mxu0 %vm3190_vm0, %v3189_v5 }
 0x156   :  { %v2458_v29 = vpop.f32.mrf.mxu0 }
 0x157   :  { %v719_v25 = vpop.f32.mrf.mxu1  ;;  %2995 = vmatmul.mubr.msk.f32.gmra.mxu1 %vm118_vm5, %v5064_v63 }
 0x158   :  { %v332_v37 = vpop.f32.mrf.mxu0  ;;  %2882 = vmatmul.mubr.msk.f32.gmra.mxu0 %vm116_vm1, %v5064_v63  ;;  %2997 = vmatprep.mubr.msk.f32.mxu1 %vm3190_vm0, %v3189_v5  ;;  %vm5135_vm1 = vcmp.eq.s32.totalorder %v5134_v10, %v3531_v8 }
 0x159   :  { %v4454_v48 = vadd.f32 %v707_v11, %v332_v37  ;;  %v2574_v43 = vpop.f32.mrf.mxu1  ;;  %2884 = vmatprep.mubr.msk.f32.mxu0 %vm3190_vm0, %v3189_v5  ;;  %vm5140_vm4 = vmmov %vm5135_vm1 }
 0x15a   :  { %v2461_v54 = vpop.f32.mrf.mxu0 }
 0x15b   :  { %v725_v51 = vpop.f32.mrf.mxu1  ;;  %2998 = vmatmul.mubr.msk.f32.gmra.mxu1 %vm119_vm6, %v5064_v63 }
 0x15c   :  { %v342_v60 = vpop.f32.mrf.mxu0  ;;  %2885 = vmatmul.mubr.msk.f32.gmra.mxu0 %vm117_vm3, %v5064_v63  ;;  %3000 = vmatprep.mubr.msk.f32.mxu1 %vm3190_vm0, %v3189_v5  ;;  %vm5139_vm3 = vcmp.eq.s32.totalorder %v5138_v39, %v3531_v8 }
 0x15d   :  { %v4468_v7 = vadd.f32 %v713_v23, %v342_v60  ;;  %v2577_v1 = vpop.f32.mrf.mxu1  ;;  %2887 = vmatprep.mubr.msk.f32.mxu0 %vm3190_vm0, %v3189_v5  ;;  %v5136_v23 = vld [vmem:[#allocation19_spill] sm:$0xff]  ;;  %v5141_v60 = vld [vmem:[#allocation21_spill] sm:$0xff] }
 0x15e   :  { %v2464_v18 = vpop.f32.mrf.mxu0  ;;  %vm5137_vm2 = vcmp.eq.s32.totalorder %v5136_v23, %v3531_v8 }
 0x15f   :  { %v731_v13 = vpop.f32.mrf.mxu1  ;;  %3001 = vmatmul.mubr.msk.f32.gmra.mxu1 %vm120_vm7, %v5064_v63 }
 0x160   :  { %v352_v20 = vpop.f32.mrf.mxu0  ;;  %2888 = vmatmul.mubr.msk.f32.gmra.mxu0 %vm118_vm5, %v5064_v63  ;;  %3003 = vmatprep.mubr.msk.f32.mxu1 %vm3190_vm0, %v3189_v5  ;;  %vm5142_vm5 = vcmp.eq.s32.totalorder %v5141_v60, %v3531_v8 }
 0x161   :  { %v4482_v46 = vadd.f32 %v719_v25, %v352_v20  ;;  %v2580_v40 = vpop.f32.mrf.mxu1  ;;  %2890 = vmatprep.mubr.msk.f32.mxu0 %vm3190_vm0, %v3189_v5 }
 0x162   :  { %v2467_v56 = vpop.f32.mrf.mxu0  ;;  %v5144_v40 = vld [vmem:[#allocation22_spill] sm:$0xff] }
 0x163   :  { %v737_v57 = vpop.f32.mrf.mxu1  ;;  %3004 = vmatmul.mubr.msk.f32.gmra.mxu1 %vm121_vm8, %v5064_v63 }
 0x164   :  { %v362_v47 = vpop.f32.mrf.mxu0  ;;  %2891 = vmatmul.mubr.msk.f32.gmra.mxu0 %vm119_vm6, %v5064_v63  ;;  %3006 = vmatprep.mubr.msk.f32.mxu1 %vm3190_vm0, %v3189_v5  ;;  %vm5143_vm6 = vmmov %vm5137_vm2 }
 0x165   :  { %v4496_v31 = vadd.f32 %v725_v51, %v362_v47  ;;  %v2583_v49 = vpop.f32.mrf.mxu1  ;;  %2893 = vmatprep.mubr.msk.f32.mxu0 %vm3190_vm0, %v3189_v5 }
 0x166   :  { %v2470_v4 = vpop.f32.mrf.mxu0 }
 0x167   :  { %v743_v61 = vpop.f32.mrf.mxu1  ;;  %3007 = vmatmul.mubr.msk.f32.gmra.mxu1 %vm122_vm9, %v5064_v63  ;;  %v5147_v4 = vld [vmem:[#allocation23_spill] sm:$0xff] }
 0x168   :  { %v372_v59 = vpop.f32.mrf.mxu0  ;;  %2894 = vmatmul.mubr.msk.f32.gmra.mxu0 %vm120_vm7, %v5064_v63  ;;  %3009 = vmatprep.mubr.msk.f32.mxu1 %vm3190_vm0, %v3189_v5  ;;  %vm5145_vm7 = vcmp.eq.s32.totalorder %v5144_v40, %v3531_v8 }
 0x169   :  { %v4510_v0 = vadd.f32 %v731_v13, %v372_v59  ;;  %v2586_v42 = vpop.f32.mrf.mxu1  ;;  %2896 = vmatprep.mubr.msk.f32.mxu0 %vm3190_vm0, %v3189_v5 }
 0x16a   :  { %v2473_v44 = vpop.f32.mrf.mxu0 }
 0x16b   :  { %v749_v30 = vpop.f32.mrf.mxu1  ;;  %3010 = vmatmul.mubr.msk.f32.gmra.mxu1 %vm123_vm10, %v5064_v63 }
 0x16c   :  { %v382_v45 = vpop.f32.mrf.mxu0  ;;  %2897 = vmatmul.mubr.msk.f32.gmra.mxu0 %vm121_vm8, %v5064_v63  ;;  %3012 = vmatprep.mubr.msk.f32.mxu1 %vm3190_vm0, %v3189_v5  ;;  %vm5146_vm8 = vmmov %vm5139_vm3 }
 0x16d   :  { %v4524_v55 = vadd.f32 %v737_v57, %v382_v45  ;;  %v2589_v12 = vpop.f32.mrf.mxu1  ;;  %2899 = vmatprep.mubr.msk.f32.mxu0 %vm3190_vm0, %v3189_v5 }
 0x16e   :  { %v2476_v6 = vpop.f32.mrf.mxu0 }
 0x16f   :  { %v755_v50 = vpop.f32.mrf.mxu1  ;;  %3013 = vmatmul.mubr.msk.f32.gmra.mxu1 %vm124_vm11, %v5064_v63 }
 0x170   :  { %v392_v32 = vpop.f32.mrf.mxu0  ;;  %2900 = vmatmul.mubr.msk.f32.gmra.mxu0 %vm122_vm9, %v5064_v63  ;;  %3015 = vmatprep.mubr.msk.f32.mxu1 %vm3190_vm0, %v3189_v5  ;;  %vm5148_vm9 = vcmp.eq.s32.totalorder %v5147_v4, %v3531_v8 }
 0x171   :  { %v4538_v52 = vadd.f32 %v743_v61, %v392_v32  ;;  %v2592_v14 = vpop.f32.mrf.mxu1  ;;  %2902 = vmatprep.mubr.msk.f32.mxu0 %vm3190_vm0, %v3189_v5 }
 0x172   :  { %v2479_v34 = vpop.f32.mrf.mxu0 }
 0x173   :  { %v761_v53 = vpop.f32.mrf.mxu1  ;;  %3016 = vmatmul.mubr.msk.f32.gmra.mxu1 %vm5135_vm1, %v5064_v63  ;;  %vm5152_vm1 = vmmov %vm5145_vm7 }
 0x174   :  { %v402_v11 = vpop.f32.mrf.mxu0  ;;  %2903 = vmatmul.mubr.msk.f32.gmra.mxu0 %vm123_vm10, %v5064_v63  ;;  %3018 = vmatprep.mubr.msk.f32.mxu1 %vm3190_vm0, %v3189_v5  ;;  %vm5149_vm10 = vmmov %vm5142_vm5 }
 0x175   :  { %v4552_v58 = vadd.f32 %v749_v30, %v402_v11  ;;  %v2595_v21 = vpop.f32.mrf.mxu1  ;;  %2905 = vmatprep.mubr.msk.f32.mxu0 %vm3190_vm0, %v3189_v5  ;;  %v5150_v30 = vld [vmem:[#allocation24_spill] sm:$0xff]  ;;  %v5156_v11 = vld [vmem:[#allocation26_spill] sm:$0xff] }
 0x176   :  { %v2482_v15 = vpop.f32.mrf.mxu0 }
 0x177   :  { %v767_v22 = vpop.f32.mrf.mxu1  ;;  %3019 = vmatmul.mubr.msk.f32.gmra.mxu1 %vm5137_vm2, %v5064_v63  ;;  %vm5154_vm2 = vcmp.eq.s32.totalorder %v5153_v26, %v3531_v8 }
 0x178   :  { %v412_v41 = vpop.f32.mrf.mxu0  ;;  %2906 = vmatmul.mubr.msk.f32.gmra.mxu0 %vm124_vm11, %v5064_v63  ;;  %3021 = vmatprep.mubr.msk.f32.mxu1 %vm3190_vm0, %v3189_v5  ;;  %vm5151_vm11 = vcmp.eq.s32.totalorder %v5150_v30, %v3531_v8 }
 0x179   :  { %v4566_v16 = vadd.f32 %v755_v50, %v412_v41  ;;  %v2598_v17 = vpop.f32.mrf.mxu1  ;;  %2908 = vmatprep.mubr.msk.f32.mxu0 %vm3190_vm0, %v3189_v5 }
 0x17a   :  { %v2485_v29 = vpop.f32.mrf.mxu0  ;;  %v5159_v17 = vld [vmem:[#allocation28_spill] sm:$0xff] }
 0x17b   :  { %v773_v25 = vpop.f32.mrf.mxu1  ;;  %3022 = vmatmul.mubr.msk.f32.gmra.mxu1 %vm5139_vm3, %v5064_v63  ;;  %vm5155_vm3 = vmmov %vm5148_vm9 }
 0x17c   :  { %v422_v37 = vpop.f32.mrf.mxu0  ;;  %2909 = vmatmul.mubr.msk.f32.gmra.mxu0 %vm5140_vm4, %v5064_v63  ;;  %3024 = vmatprep.mubr.msk.f32.mxu1 %vm3190_vm0, %v3189_v5  ;;  %vm5157_vm4 = vcmp.eq.s32.totalorder %v5156_v11, %v3531_v8 }
 0x17d   :  { %v4580_v43 = vadd.f32 %v761_v53, %v422_v37  ;;  %v2601_v54 = vpop.f32.mrf.mxu1  ;;  %2911 = vmatprep.mubr.msk.f32.mxu0 %vm3190_vm0, %v3189_v5 }
 0x17e   :  { %v2488_v51 = vpop.f32.mrf.mxu0 }
 0x17f   :  { %v779_v62 = vpop.f32.mrf.mxu1  ;;  %3025 = vmatmul.mubr.msk.f32.gmra.mxu1 %vm5142_vm5, %v5064_v63  ;;  %vm5158_vm5 = vmmov %vm5151_vm11 }
 0x180   :  { %v432_v1 = vpop.f32.mrf.mxu0  ;;  %2912 = vmatmul.mubr.msk.f32.gmra.mxu0 %vm5143_vm6, %v5064_v63  ;;  %3027 = vmatprep.mubr.msk.f32.mxu1 %vm3190_vm0, %v3189_v5  ;;  %vm5160_vm6 = vcmp.eq.s32.totalorder %v5159_v17, %v3531_v8 }
 0x181   :  { %v4594_v18 = vadd.f32 %v767_v22, %v432_v1  ;;  %v2604_v13 = vpop.f32.mrf.mxu1  ;;  %2914 = vmatprep.mubr.msk.f32.mxu0 %vm3190_vm0, %v3189_v5 }
 0x182   :  { %v2491_v38 = vpop.f32.mrf.mxu0 }
 0x183   :  { %v785_v20 = vpop.f32.mrf.mxu1  ;;  %3028 = vmatmul.mubr.msk.f32.gmra.mxu1 %vm5145_vm7, %v5064_v63  ;;  %vm5161_vm7 = vmmov %vm5154_vm2 }
 0x184   :  { %v442_v56 = vpop.f32.mrf.mxu0  ;;  %2915 = vmatmul.mubr.msk.f32.gmra.mxu0 %vm5146_vm8, %v5064_v63  ;;  %3030 = vmatprep.mubr.msk.f32.mxu1 %vm3190_vm0, %v3189_v5  ;;  %vm5163_vm8 = vmmov %vm5157_vm4 }
 0x185   :  { %v4608_v57 = vadd.f32 %v773_v25, %v442_v56  ;;  %v2607_v2 = vpop.f32.mrf.mxu1  ;;  %2917 = vmatprep.mubr.msk.f32.mxu0 %vm3190_vm0, %v3189_v5 }
 0x186   :  { %v2494_v47 = vpop.f32.mrf.mxu0 }
 0x187   :  { %v791_v49 = vpop.f32.mrf.mxu1  ;;  %3031 = vmatmul.mubr.msk.f32.gmra.mxu1 %vm5148_vm9, %v5064_v63  ;;  %vm5164_vm9 = vmmov %vm5160_vm6 }
 0x188   :  { %v452_v61 = vpop.f32.mrf.mxu0  ;;  %2918 = vmatmul.mubr.msk.f32.gmra.mxu0 %vm5149_vm10, %v5064_v63  ;;  %3033 = vmatprep.mubr.msk.f32.mxu1 %vm3190_vm0, %v3189_v5 }
 0x189   :  { %v4622_v3 = vadd.f32 %v779_v62, %v452_v61  ;;  %v2610_v59 = vpop.f32.mrf.mxu1  ;;  %2920 = vmatprep.mubr.msk.f32.mxu0 %vm3190_vm0, %v3189_v5 }
 0x18a   :  { %v2497_v42 = vpop.f32.mrf.mxu0 }
 0x18b   :  { %v797_v44 = vpop.f32.mrf.mxu1  ;;  %3034 = vmatmul.mubr.msk.f32.gmra.mxu1 %vm5151_vm11, %v5064_v63 }
 0x18c   :  { %v462_v33 = vpop.f32.mrf.mxu0  ;;  %2921 = vmatmul.mubr.msk.f32.gmra.mxu0 %vm5152_vm1, %v5064_v63  ;;  %3036 = vmatprep.mubr.msk.f32.mxu1 %vm3190_vm0, %v3189_v5 }
 0x18d   :  { %v4636_v45 = vadd.f32 %v785_v20, %v462_v33  ;;  %v2613_v12 = vpop.f32.mrf.mxu1  ;;  %2923 = vmatprep.mubr.msk.f32.mxu0 %vm3190_vm0, %v3189_v5 }
 0x18e   :  { %v2500_v6 = vpop.f32.mrf.mxu0 }
 0x18f   :  { %v803_v50 = vpop.f32.mrf.mxu1  ;;  %3037 = vmatmul.mubr.msk.f32.gmra.mxu1 %vm5154_vm2, %v5064_v63 }
 0x190   :  { %v472_v32 = vpop.f32.mrf.mxu0  ;;  %2924 = vmatmul.mubr.msk.f32.gmra.mxu0 %vm5155_vm3, %v5064_v63  ;;  %3039 = vmatprep.mubr.msk.f32.mxu1 %vm3190_vm0, %v3189_v5 }
 0x191   :  { %v4650_v14 = vadd.f32 %v791_v49, %v472_v32  ;;  %v2616_v34 = vpop.f32.mrf.mxu1  ;;  %2926 = vmatprep.mubr.msk.f32.mxu0 %vm3190_vm0, %v3189_v5 }
 0x192   :  { %v2503_v53 = vpop.f32.mrf.mxu0 }
 0x193   :  { %v809_v10 = vpop.f32.mrf.mxu1  ;;  %3040 = vmatmul.mubr.msk.f32.gmra.mxu1 %vm5157_vm4, %v5064_v63 }
 0x194   :  { %v482_v21 = vpop.f32.mrf.mxu0  ;;  %2927 = vmatmul.mubr.msk.f32.gmra.mxu0 %vm5158_vm5, %v5064_v63  ;;  %3042 = vmatprep.mubr.msk.f32.mxu1 %vm3190_vm0, %v3189_v5 }
 0x195   :  { %v4664_v15 = vadd.f32 %v797_v44, %v482_v21  ;;  %v2619_v22 = vpop.f32.mrf.mxu1  ;;  %2929 = vmatprep.mubr.msk.f32.mxu0 %vm3190_vm0, %v3189_v5 }
 0x196   :  { %v2506_v23 = vpop.f32.mrf.mxu0 }
 0x197   :  { %v815_v41 = vpop.f32.mrf.mxu1  ;;  %3043 = vmatmul.mubr.msk.f32.gmra.mxu1 %vm5160_vm6, %v5064_v63 }
 0x198   :  { %v492_v29 = vpop.f32.mrf.mxu0  ;;  %2930 = vmatmul.mubr.msk.f32.gmra.mxu0 %vm5161_vm7, %v5064_v63  ;;  %3045 = vmatprep.mubr.msk.f32.mxu1 %vm3190_vm0, %v3189_v5 }
 0x199   :  { %v4678_v25 = vadd.f32 %v803_v50, %v492_v29  ;;  %v2622_v39 = vpop.f32.mrf.mxu1  ;;  %2932 = vmatprep.mubr.msk.f32.mxu0 %vm3190_vm0, %v3189_v5 }
 0x19a   :  { %v2509_v37 = vpop.f32.mrf.mxu0 }
 0x19b   :  { %v821_v54 = vpop.f32.mrf.mxu1  ;;  %3046 = vmatmul.mubr.msk.f32.gmra.mxu1 %vm135_vm14, %v5064_v63 }
 0x19c   :  { %v502_v62 = vpop.f32.mrf.mxu0  ;;  %2933 = vmatmul.mubr.msk.f32.gmra.mxu0 %vm5163_vm8, %v5064_v63  ;;  %3048 = vmatprep.mubr.msk.f32.mxu1 %vm3190_vm0, %v3189_v5 }
 0x19d   :  { %v4692_v60 = vadd.f32 %v809_v10, %v502_v62  ;;  %v2625_v1 = vpop.f32.mrf.mxu1  ;;  %2935 = vmatprep.mubr.msk.f32.mxu0 %vm3190_vm0, %v3189_v5 }
 0x19e   :  { %v2512_v13 = vpop.f32.mrf.mxu0 }
 0x19f   :  { %v827_v38 = vpop.f32.mrf.mxu1  ;;  %3049 = vmatmul.mubr.msk.f32.gmra.mxu1 %vm136_vm15, %v5064_v63 }
 0x1a0   :  { %v512_v20 = vpop.f32.mrf.mxu0  ;;  %2936 = vmatmul.mubr.msk.f32.gmra.mxu0 %vm5164_vm9, %v5064_v63  ;;  %3051 = vmatprep.mubr.msk.f32.mxu1 %vm3190_vm0, %v3189_v5 }
 0x1a1   :  { %v4706_v40 = vadd.f32 %v815_v41, %v512_v20  ;;  %v2628_v56 = vpop.f32.mrf.mxu1  ;;  %2938 = vmatprep.mubr.msk.f32.mxu0 %vm3190_vm0, %v3189_v5 }
 0x1a2   :  { %v2515_v2 = vpop.f32.mrf.mxu0 }
 0x1a3   :  { %v1188_v47 = vpop.f32.mrf.mxu1  ;;  %3052 = vmatmul.mubr.msk.f32.gmra.mxu1 %vm137_vm12, %v5064_v63 }
 0x1a4   :  { %v522_v49 = vpop.f32.mrf.mxu0  ;;  %2939 = vmatmul.mubr.msk.f32.gmra.mxu0 %vm135_vm14, %v5064_v63  ;;  %3054 = vmatprep.mubr.msk.f32.mxu1 %vm3190_vm0, %v3189_v5 }
 0x1a5   :  { %v4720_v4 = vadd.f32 %v821_v54, %v522_v49  ;;  %v2770_v61 = vpop.f32.mrf.mxu1  ;;  %2941 = vmatprep.mubr.msk.f32.mxu0 %vm3190_vm0, %v3189_v5 }
 0x1a6   :  { %v2518_v59 = vpop.f32.mrf.mxu0 }
 0x1a7   :  { %v1196_v42 = vpop.f32.mrf.mxu1  ;;  %3055 = vmatmul.mubr.msk.f32.gmra.mxu1 %vm138_vm13, %v5064_v63 }
 0x1a8   :  { %v532_v44 = vpop.f32.mrf.mxu0  ;;  %2942 = vmatmul.mubr.msk.f32.gmra.mxu0 %vm136_vm15, %v5064_v63 }
 0x1a9   :  { %v4732_v30 = vadd.f32 %v827_v38, %v532_v44  ;;  %v2773_v33 = vpop.f32.mrf.mxu1  ;;  %2944 = vmatprep.mubr.msk.f32.mxu0 %vm3190_vm0, %v3189_v5 }
 0x1aa   :  { %v2521_v12 = vpop.f32.mrf.mxu0 }
 0x1ab   :  { %v1204_v6 = vpop.f32.mrf.mxu1 }
 0x1ac   :  { %v931_v50 = vpop.f32.mrf.mxu0  ;;  %2945 = vmatmul.mubr.msk.f32.gmra.mxu0 %vm137_vm12, %v5064_v63 }
 0x1ad   :  { %v932_v26 = vadd.f32 %v931_v50, %v4401_v19  ;;  %v2776_v32 = vpop.f32.mrf.mxu1  ;;  %2947 = vmatprep.mubr.msk.f32.mxu0 %vm3190_vm0, %v3189_v5 }
 0x1ae   :  { %v2663_v36 = vpop.f32.mrf.mxu0 }
 0x1af   :  { %v1212_v34 = vpop.f32.mrf.mxu1  ;;  %v4743_v53 = vadd.f32 %v1188_v47, %v932_v26 }
 0x1b0   :  { %v938_v10 = vpop.f32.mrf.mxu0  ;;  %2948 = vmatmul.mubr.msk.f32.gmra.mxu0 %vm138_vm13, %v5064_v63 }
 0x1b1   :  { %v939_v11 = vadd.f32 %v938_v10, %v4412_v9  ;;  %v2779_v28 = vpop.f32.mrf.mxu1 }
 0x1b2   :  { %v2666_v21 = vpop.f32.mrf.mxu0 }
 0x1b3   :  { %v1220_v22 = vpop.f32.mrf.mxu1  ;;  %v4750_v19 = vadd.f32 %v1196_v42, %v939_v11 }
 0x1b4   :  { %v945_v23 = vpop.f32.mrf.mxu0 }
 0x1b5   :  { %v946_v5 = vadd.f32 %v945_v23, %v4426_v35  ;;  %v2782_v41 = vpop.f32.mrf.mxu1 }
 0x1b6   :  { %v2669_v17 = vpop.f32.mrf.mxu0 }
 0x1b7   :  { %v1228_v29 = vpop.f32.mrf.mxu1  ;;  %v4753_v39 = vadd.f32 %v1204_v6, %v946_v5 }
 0x1b8   :  { %v952_v37 = vpop.f32.mrf.mxu0 }
 0x1b9   :  { %v953_v54 = vadd.f32 %v952_v37, %v4440_v24  ;;  %v2785_v8 = vpop.f32.mrf.mxu1 }
 0x1ba   :  { %v2672_v63 = vpop.f32.mrf.mxu0 }
 0x1bb   :  { %v1236_v27 = vpop.f32.mrf.mxu1  ;;  %v4756_v9 = vadd.f32 %v1212_v34, %v953_v54 }
 0x1bc   :  { %v959_v51 = vpop.f32.mrf.mxu0 }
 0x1bd   :  { %v960_v62 = vadd.f32 %v959_v51, %v4454_v48  ;;  %v2788_v1 = vpop.f32.mrf.mxu1 }
 0x1be   :  { %v2675_v13 = vpop.f32.mrf.mxu0 }
 0x1bf   :  { %v1244_v38 = vpop.f32.mrf.mxu1  ;;  %v4759_v35 = vadd.f32 %v1220_v22, %v960_v62 }
 0x1c0   :  { %v966_v20 = vpop.f32.mrf.mxu0 }
 0x1c1   :  { %v967_v56 = vadd.f32 %v966_v20, %v4468_v7  ;;  %v2791_v2 = vpop.f32.mrf.mxu1 }
 0x1c2   :  { %v2678_v47 = vpop.f32.mrf.mxu0 }
 0x1c3   :  { %v1252_v49 = vpop.f32.mrf.mxu1  ;;  %v4762_v24 = vadd.f32 %v1228_v29, %v967_v56 }
 0x1c4   :  { %v973_v61 = vpop.f32.mrf.mxu0 }
 0x1c5   :  { %v974_v59 = vadd.f32 %v973_v61, %v4482_v46  ;;  %v2794_v42 = vpop.f32.mrf.mxu1 }
 0x1c6   :  { %v2681_v44 = vpop.f32.mrf.mxu0 }
 0x1c7   :  { %v1260_v33 = vpop.f32.mrf.mxu1  ;;  %v4765_v48 = vadd.f32 %v1236_v27, %v974_v59 }
 0x1c8   :  { %v980_v12 = vpop.f32.mrf.mxu0 }
 0x1c9   :  { %v981_v6 = vadd.f32 %v980_v12, %v4496_v31  ;;  %v2797_v50 = vpop.f32.mrf.mxu1 }
 0x1ca   :  { %v2684_v26 = vpop.f32.mrf.mxu0 }
 0x1cb   :  { %v1268_v32 = vpop.f32.mrf.mxu1  ;;  %v4768_v7 = vadd.f32 %v1244_v38, %v981_v6 }
 0x1cc   :  { %v987_v36 = vpop.f32.mrf.mxu0 }
 0x1cd   :  { %v988_v34 = vadd.f32 %v987_v36, %v4510_v0  ;;  %v2800_v10 = vpop.f32.mrf.mxu1 }
 0x1ce   :  { %v2687_v11 = vpop.f32.mrf.mxu0 }
 0x1cf   :  { %v1276_v28 = vpop.f32.mrf.mxu1  ;;  %v4771_v46 = vadd.f32 %v1252_v49, %v988_v34 }
 0x1d0   :  { %v994_v21 = vpop.f32.mrf.mxu0 }
 0x1d1   :  { %v995_v22 = vadd.f32 %v994_v21, %v4524_v55  ;;  %v2803_v23 = vpop.f32.mrf.mxu1 }
 0x1d2   :  { %v2690_v5 = vpop.f32.mrf.mxu0 }
 0x1d3   :  { %v1284_v41 = vpop.f32.mrf.mxu1  ;;  %v4774_v31 = vadd.f32 %v1260_v33, %v995_v22 }
 0x1d4   :  { %v1001_v17 = vpop.f32.mrf.mxu0 }
 0x1d5   :  { %v1002_v29 = vadd.f32 %v1001_v17, %v4538_v52  ;;  %v2806_v37 = vpop.f32.mrf.mxu1 }
 0x1d6   :  { %v2693_v54 = vpop.f32.mrf.mxu0 }
 0x1d7   :  { %v1292_v8 = vpop.f32.mrf.mxu1  ;;  %v4777_v0 = vadd.f32 %v1268_v32, %v1002_v29 }
 0x1d8   :  { %v1008_v63 = vpop.f32.mrf.mxu0 }
 0x1d9   :  { %v1009_v27 = vadd.f32 %v1008_v63, %v4552_v58  ;;  %v2809_v51 = vpop.f32.mrf.mxu1 }
 0x1da   :  { %v2696_v62 = vpop.f32.mrf.mxu0 }
 0x1db   :  { %v1300_v1 = vpop.f32.mrf.mxu1  ;;  %v4780_v55 = vadd.f32 %v1276_v28, %v1009_v27 }
 0x1dc   :  { %v1015_v13 = vpop.f32.mrf.mxu0 }
 0x1dd   :  { %v1016_v38 = vadd.f32 %v1015_v13, %v4566_v16  ;;  %v2812_v20 = vpop.f32.mrf.mxu1 }
 0x1de   :  { %v2699_v56 = vpop.f32.mrf.mxu0 }
 0x1df   :  { %v1308_v2 = vpop.f32.mrf.mxu1  ;;  %v4783_v52 = vadd.f32 %v1284_v41, %v1016_v38 }
 0x1e0   :  { %v1022_v47 = vpop.f32.mrf.mxu0 }
 0x1e1   :  { %v1023_v49 = vadd.f32 %v1022_v47, %v4580_v43  ;;  %v2815_v61 = vpop.f32.mrf.mxu1 }
 0x1e2   :  { %v2702_v59 = vpop.f32.mrf.mxu0 }
 0x1e3   :  { %v1316_v42 = vpop.f32.mrf.mxu1  ;;  %v4786_v58 = vadd.f32 %v1292_v8, %v1023_v49 }
 0x1e4   :  { %v1029_v44 = vpop.f32.mrf.mxu0 }
 0x1e5   :  { %v1030_v33 = vadd.f32 %v1029_v44, %v4594_v18  ;;  %v2818_v12 = vpop.f32.mrf.mxu1 }
 0x1e6   :  { %v2705_v6 = vpop.f32.mrf.mxu0 }
 0x1e7   :  { %v1324_v50 = vpop.f32.mrf.mxu1  ;;  %v4789_v16 = vadd.f32 %v1300_v1, %v1030_v33 }
 0x1e8   :  { %v1036_v26 = vpop.f32.mrf.mxu0 }
 0x1e9   :  { %v1037_v32 = vadd.f32 %v1036_v26, %v4608_v57  ;;  %v2821_v36 = vpop.f32.mrf.mxu1 }
 0x1ea   :  { %v2708_v34 = vpop.f32.mrf.mxu0 }
 0x1eb   :  { %v1332_v10 = vpop.f32.mrf.mxu1  ;;  %v4792_v43 = vadd.f32 %v1308_v2, %v1037_v32 }
 0x1ec   :  { %v1043_v11 = vpop.f32.mrf.mxu0 }
 0x1ed   :  { %v1044_v28 = vadd.f32 %v1043_v11, %v4622_v3  ;;  %v2824_v21 = vpop.f32.mrf.mxu1 }
 0x1ee   :  { %v2711_v22 = vpop.f32.mrf.mxu0 }
 0x1ef   :  { %v1340_v23 = vpop.f32.mrf.mxu1  ;;  %v4795_v18 = vadd.f32 %v1316_v42, %v1044_v28 }
 0x1f0   :  { %v1050_v5 = vpop.f32.mrf.mxu0 }
 0x1f1   :  { %v1051_v41 = vadd.f32 %v1050_v5, %v4636_v45  ;;  %v2827_v17 = vpop.f32.mrf.mxu1 }
 0x1f2   :  { %v2714_v29 = vpop.f32.mrf.mxu0 }
 0x1f3   :  { %v1348_v37 = vpop.f32.mrf.mxu1  ;;  %v4798_v57 = vadd.f32 %v1324_v50, %v1051_v41 }
 0x1f4   :  { %v1057_v54 = vpop.f32.mrf.mxu0 }
 0x1f5   :  { %v1058_v8 = vadd.f32 %v1057_v54, %v4650_v14  ;;  %v2830_v63 = vpop.f32.mrf.mxu1 }
 0x1f6   :  { %v2717_v27 = vpop.f32.mrf.mxu0 }
 0x1f7   :  { %v1356_v51 = vpop.f32.mrf.mxu1  ;;  %v4801_v3 = vadd.f32 %v1332_v10, %v1058_v8 }
 0x1f8   :  { %v1064_v62 = vpop.f32.mrf.mxu0 }
 0x1f9   :  { %v1065_v1 = vadd.f32 %v1064_v62, %v4664_v15  ;;  %v2833_v13 = vpop.f32.mrf.mxu1 }
 0x1fa   :  { %v2720_v38 = vpop.f32.mrf.mxu0 }
 0x1fb   :  { %v1364_v20 = vpop.f32.mrf.mxu1  ;;  %v4804_v45 = vadd.f32 %v1340_v23, %v1065_v1 }
 0x1fc   :  { %v1071_v56 = vpop.f32.mrf.mxu0 }
 0x1fd   :  { %v1072_v2 = vadd.f32 %v1071_v56, %v4678_v25  ;;  %v2836_v47 = vpop.f32.mrf.mxu1 }
 0x1fe   :  { %v2723_v49 = vpop.f32.mrf.mxu0 }
 0x1ff   :  { %v1372_v61 = vpop.f32.mrf.mxu1  ;;  %v4807_v14 = vadd.f32 %v1348_v37, %v1072_v2 }
 0x200   :  { %v1078_v59 = vpop.f32.mrf.mxu0 }
 0x201   :  { %v1079_v42 = vadd.f32 %v1078_v59, %v4692_v60  ;;  %v2839_v44 = vpop.f32.mrf.mxu1 }
 0x202   :  { %v2726_v33 = vpop.f32.mrf.mxu0 }
 0x203   :  { %v1380_v12 = vpop.f32.mrf.mxu1  ;;  %v4810_v15 = vadd.f32 %v1356_v51, %v1079_v42 }
 0x204   :  { %v1085_v6 = vpop.f32.mrf.mxu0 }
 0x205   :  { %v1086_v50 = vadd.f32 %v1085_v6, %v4706_v40  ;;  %v2842_v26 = vpop.f32.mrf.mxu1 }
 0x206   :  { %v2729_v32 = vpop.f32.mrf.mxu0 }
 0x207   :  { %v1730_v36 = vpop.f32.mrf.mxu1  ;;  %v4813_v25 = vadd.f32 %v1364_v20, %v1086_v50 }
 0x208   :  { %v1092_v34 = vpop.f32.mrf.mxu0 }
 0x209   :  { %v1093_v10 = vadd.f32 %v1092_v34, %v4720_v4  ;;  %v2984_v11 = vpop.f32.mrf.mxu1 }
 0x20a   :  { %v2732_v28 = vpop.f32.mrf.mxu0 }
 0x20b   :  { %v1736_v21 = vpop.f32.mrf.mxu1  ;;  %v4816_v60 = vadd.f32 %v1372_v61, %v1093_v10 }
 0x20c   :  { %v1099_v22 = vpop.f32.mrf.mxu0 }
 0x20d   :  { %v1100_v23 = vadd.f32 %v1099_v22, %v4732_v30  ;;  %v2987_v5 = vpop.f32.mrf.mxu1 }
 0x20e   :  { %v2735_v41 = vpop.f32.mrf.mxu0 }
 0x20f   :  { %v1742_v17 = vpop.f32.mrf.mxu1  ;;  %v4819_v40 = vadd.f32 %v1380_v12, %v1100_v23 }
 0x210   :  { %v1499_v29 = vpop.f32.mrf.mxu0 }
 0x211   :  { %v1500_v37 = vadd.f32 %v1499_v29, %v4743_v53  ;;  %v2990_v54 = vpop.f32.mrf.mxu1 }
 0x212   :  { %v2877_v8 = vpop.f32.mrf.mxu0 }
 0x213   :  { %v4822_v63 = vadd.f32 %v1730_v36, %v1500_v37  ;;  %v1748_v4 = vpop.f32.mrf.mxu1 }
 0x214   :  { %v1505_v27 = vpop.f32.mrf.mxu0 }
 0x215   :  { %v1878_v51 = vsub.f32 0.0, %v4822_v63  ;;  %v1506_v62 = vadd.f32 %v1505_v27, %v4750_v19  ;;  %v2993_v1 = vpop.f32.mrf.mxu1 }
 0x216   :  { %v2880_v30 = vpop.f32.mrf.mxu0 }
 0x217   :  { %v1903_v13 = vmul.f32 1.442695, %v1878_v51  ;;  %v4826_v38 = vadd.f32 %v1736_v21, %v1506_v62  ;;  %v1754_v20 = vpop.f32.mrf.mxu1 }
 0x218   :  { %v1511_v56 = vpop.f32.mrf.mxu0 }
 0x219   :  { %3066 = vpow2.f32 %v1903_v13  ;;  %v1879_v53 = vsub.f32 0.0, %v4826_v38  ;;  %v1512_v2 = vadd.f32 %v1511_v56, %v4753_v39  ;;  %v2996_v47 = vpop.f32.mrf.mxu1 }
 0x21a   :  { %v2883_v49 = vpop.f32.mrf.mxu0 }
 0x21b   :  { %v1905_v61 = vmul.f32 1.442695, %v1879_v53  ;;  %v4830_v59 = vadd.f32 %v1742_v17, %v1512_v2  ;;  %v1760_v42 = vpop.f32.mrf.mxu1 }
 0x21c   :  { %v1517_v44 = vpop.f32.mrf.mxu0 }
 0x21d   :  { %3068 = vpow2.f32 %v1905_v61  ;;  %v1880_v19 = vsub.f32 0.0, %v4830_v59  ;;  %v1518_v33 = vadd.f32 %v1517_v44, %v4756_v9  ;;  %v2999_v12 = vpop.f32.mrf.mxu1 }
 0x21e   :  { %v2886_v6 = vpop.f32.mrf.mxu0 }
 0x21f   :  { %v1907_v50 = vmul.f32 1.442695, %v1880_v19  ;;  %v4834_v26 = vadd.f32 %v1748_v4, %v1518_v33  ;;  %v1766_v32 = vpop.f32.mrf.mxu1 }
 0x220   :  { %v1523_v36 = vpop.f32.mrf.mxu0 }
 0x221   :  { %3070 = vpow2.f32 %v1907_v50  ;;  %v1881_v39 = vsub.f32 0.0, %v4834_v26  ;;  %v1524_v34 = vadd.f32 %v1523_v36, %v4759_v35  ;;  %v3002_v10 = vpop.f32.mrf.mxu1 }
 0x222   :  { %v2889_v11 = vpop.f32.mrf.mxu0 }
 0x223   :  { %v1909_v28 = vmul.f32 1.442695, %v1881_v39  ;;  %v4838_v21 = vadd.f32 %v1754_v20, %v1524_v34  ;;  %v1772_v22 = vpop.f32.mrf.mxu1 }
 0x224   :  { %v1529_v23 = vpop.f32.mrf.mxu0 }
 0x225   :  { %3072 = vpow2.f32 %v1909_v28  ;;  %v1882_v9 = vsub.f32 0.0, %v4838_v21  ;;  %v1530_v5 = vadd.f32 %v1529_v23, %v4762_v24  ;;  %v3005_v41 = vpop.f32.mrf.mxu1 }
 0x226   :  { %v3067_v17 = vpop.eup %3066  ;;  %v2892_v29 = vpop.f32.mrf.mxu0 }
 0x227   :  { %v1953_v37 = vadd.f32 1.0, %v3067_v17  ;;  %v1911_v54 = vmul.f32 1.442695, %v1882_v9  ;;  %v4842_v8 = vadd.f32 %v1760_v42, %v1530_v5  ;;  %v1778_v35 = vpop.f32.mrf.mxu1 }
 0x228   :  { %v1535_v4 = vpop.f32.mrf.mxu0 }
 0x229   :  { %3074 = vrcp.f32 %v1953_v37  ;;  %v1883_v27 = vsub.f32 0.0, %v4842_v8  ;;  %v1536_v51 = vadd.f32 %v1535_v4, %v4765_v48  ;;  %v3008_v62 = vpop.f32.mrf.mxu1 }
 0x22a   :  { %v3069_v1 = vpop.eup %3068  ;;  %3076 = vpow2.f32 %v1911_v54  ;;  %v2895_v30 = vpop.f32.mrf.mxu0 }
 0x22b   :  { %v1954_v13 = vadd.f32 1.0, %v3069_v1  ;;  %v1913_v24 = vmul.f32 1.442695, %v1883_v27  ;;  %v4846_v20 = vadd.f32 %v1766_v32, %v1536_v51  ;;  %v1784_v56 = vpop.f32.mrf.mxu1 }
 0x22c   :  { %v1541_v53 = vpop.f32.mrf.mxu0 }
 0x22d   :  { %3078 = vrcp.f32 %v1954_v13  ;;  %v1884_v2 = vsub.f32 0.0, %v4846_v20  ;;  %v1542_v47 = vadd.f32 %v1541_v53, %v4768_v7  ;;  %v3011_v49 = vpop.f32.mrf.mxu1 }
 0x22e   :  { %v3071_v61 = vpop.eup %3070  ;;  %3080 = vpow2.f32 %v1913_v24  ;;  %v2898_v42 = vpop.f32.mrf.mxu0 }
 0x22f   :  { %v1955_v48 = vadd.f32 1.0, %v3071_v61  ;;  %v1915_v44 = vmul.f32 1.442695, %v1884_v2  ;;  %v4850_v19 = vadd.f32 %v1772_v22, %v1542_v47  ;;  %v1790_v33 = vpop.f32.mrf.mxu1 }
 0x230   :  { %v1547_v12 = vpop.f32.mrf.mxu0 }
 0x231   :  { %3082 = vrcp.f32 %v1955_v48  ;;  %v1885_v6 = vsub.f32 0.0, %v4850_v19  ;;  %v1548_v50 = vadd.f32 %v1547_v12, %v4771_v46  ;;  %v3014_v32 = vpop.f32.mrf.mxu1 }
 0x232   :  { %v3073_v36 = vpop.eup %3072  ;;  %3084 = vpow2.f32 %v1915_v44  ;;  %v2901_v39 = vpop.f32.mrf.mxu0 }
 0x233   :  { %v1956_v7 = vadd.f32 1.0, %v3073_v36  ;;  %v1917_v34 = vmul.f32 1.442695, %v1885_v6  ;;  %v4854_v10 = vadd.f32 %v1778_v35, %v1548_v50  ;;  %v1796_v11 = vpop.f32.mrf.mxu1 }
 0x234   :  { %v1553_v28 = vpop.f32.mrf.mxu0 }
 0x235   :  { %3086 = vrcp.f32 %v1956_v7  ;;  %v1886_v22 = vsub.f32 0.0, %v4854_v10  ;;  %v1554_v23 = vadd.f32 %v1553_v28, %v4774_v31  ;;  %v3017_v9 = vpop.f32.mrf.mxu1 }
 0x236   :  { %v3075_v5 = vpop.eup %3074  ;;  %3088 = vpow2.f32 %v1917_v34  ;;  %v2904_v41 = vpop.f32.mrf.mxu0 }
 0x237   :  { %v3077_v46 = vpop.eup %3076  ;;  %v2003_v17 = vmul.f32 %v3075_v5, %v4822_v63  ;;  %v1919_v29 = vmul.f32 1.442695, %v1886_v22  ;;  %v4859_v37 = vadd.f32 %v1784_v56, %v1554_v23  ;;  %v1802_v54 = vpop.f32.mrf.mxu1 }
 0x238   :  { %v1957_v35 = vadd.f32 1.0, %v3077_v46  ;;  %v1559_v4 = vpop.f32.mrf.mxu0 }
 0x239   :  { %2028 = vst [vmem:[#allocation2] sm:$0xff] %v2003_v17  ;;  %3090 = vpow2.f32 %v1919_v29  ;;  %v1887_v27 = vsub.f32 0.0, %v4859_v37  ;;  %v1560_v51 = vadd.f32 %v1559_v4, %v4777_v0  ;;  %v3020_v31 = vpop.f32.mrf.mxu1 }
 0x23a   :  { %v3079_v62 = vpop.eup %3078  ;;  %3092 = vrcp.f32 %v1957_v35  ;;  %v2907_v1 = vpop.f32.mrf.mxu0 }
 0x23b   :  { %v3081_v30 = vpop.eup %3080  ;;  %v2004_v13 = vmul.f32 %v3079_v62, %v4826_v38  ;;  %v1921_v63 = vmul.f32 1.442695, %v1887_v27  ;;  %v4864_v24 = vadd.f32 %v1790_v33, %v1560_v51  ;;  %v1808_v56 = vpop.f32.mrf.mxu1 }
 0x23c   :  { %v1958_v53 = vadd.f32 1.0, %v3081_v30  ;;  %v1565_v2 = vpop.f32.mrf.mxu0 }
 0x23d   :  { %2029 = vst [vmem:[#allocation2 + $0x8] sm:$0xff] %v2004_v13  ;;  %3094 = vpow2.f32 %v1921_v63  ;;  %v1888_v47 = vsub.f32 0.0, %v4864_v24  ;;  %v1566_v49 = vadd.f32 %v1565_v2, %v4780_v55  ;;  %v3023_v0 = vpop.f32.mrf.mxu1 }
 0x23e   :  { %v3083_v61 = vpop.eup %3082  ;;  %3096 = vrcp.f32 %v1958_v53  ;;  %v2910_v42 = vpop.f32.mrf.mxu0 }
 0x23f   :  { %v3085_v48 = vpop.eup %3084  ;;  %v2005_v44 = vmul.f32 %v3083_v61, %v4830_v59  ;;  %v1923_v38 = vmul.f32 1.442695, %v1888_v47  ;;  %v4869_v12 = vadd.f32 %v1796_v11, %v1566_v49  ;;  %v1814_v33 = vpop.f32.mrf.mxu1 }
 0x240   :  { %v1959_v6 = vadd.f32 1.0, %v3085_v48  ;;  %v1571_v50 = vpop.f32.mrf.mxu0 }
 0x241   :  { %2030 = vst [vmem:[#allocation2 + $0x10] sm:$0xff] %v2005_v44  ;;  %3098 = vpow2.f32 %v1923_v38  ;;  %v1889_v32 = vsub.f32 0.0, %v4869_v12  ;;  %v1572_v36 = vadd.f32 %v1571_v50, %v4783_v52  ;;  %v3026_v55 = vpop.f32.mrf.mxu1 }
 0x242   :  { %v3087_v39 = vpop.eup %3086  ;;  %3100 = vrcp.f32 %v1959_v6  ;;  %v2913_v7 = vpop.f32.mrf.mxu0 }
 0x243   :  { %v3089_v34 = vpop.eup %3088  ;;  %v2006_v28 = vmul.f32 %v3087_v39, %v4834_v26  ;;  %v1925_v59 = vmul.f32 1.442695, %v1889_v32  ;;  %v4874_v22 = vadd.f32 %v1802_v54, %v1572_v36  ;;  %v1820_v11 = vpop.f32.mrf.mxu1 }
 0x244   :  { %v1960_v23 = vadd.f32 1.0, %v3089_v34  ;;  %v1577_v9 = vpop.f32.mrf.mxu0 }
 0x245   :  { %2031 = vst [vmem:[#allocation2 + $0x18] sm:$0xff] %v2006_v28  ;;  %3102 = vpow2.f32 %v1925_v59  ;;  %v1890_v5 = vsub.f32 0.0, %v4874_v22  ;;  %v1578_v41 = vadd.f32 %v1577_v9, %v4786_v58  ;;  %v3029_v52 = vpop.f32.mrf.mxu1 }
 0x246   :  { %v3091_v46 = vpop.eup %3090  ;;  %3104 = vrcp.f32 %v1960_v23  ;;  %v2916_v17 = vpop.f32.mrf.mxu0 }
 0x247   :  { %v3093_v29 = vpop.eup %3092  ;;  %v1961_v35 = vadd.f32 1.0, %v3091_v46  ;;  %v1927_v4 = vmul.f32 1.442695, %v1890_v5  ;;  %v4878_v26 = vadd.f32 %v1808_v56, %v1578_v41  ;;  %v1826_v54 = vpop.f32.mrf.mxu1 }
 0x248   :  { %v2007_v27 = vmul.f32 %v3093_v29, %v4838_v21  ;;  %v1583_v51 = vpop.f32.mrf.mxu0 }
 0x249   :  { %3106 = vrcp.f32 %v1961_v35  ;;  %v1891_v31 = vsub.f32 0.0, %v4878_v26  ;;  %v1584_v62 = vadd.f32 %v1583_v51, %v4789_v16  ;;  %v3032_v1 = vpop.f32.mrf.mxu1 }
 0x24a   :  { %v3095_v58 = vpop.eup %3094  ;;  %2032 = vst [vmem:[#allocation2 + $0x20] sm:$0xff] %v2007_v27  ;;  %3108 = vpow2.f32 %v1927_v4  ;;  %v2919_v30 = vpop.f32.mrf.mxu0 }
 0x24b   :  { %v3097_v13 = vpop.eup %3096  ;;  %v1962_v63 = vadd.f32 1.0, %v3095_v58  ;;  %v1929_v53 = vmul.f32 1.442695, %v1891_v31  ;;  %v4883_v2 = vadd.f32 %v1814_v33, %v1584_v62  ;;  %v1832_v56 = vpop.f32.mrf.mxu1 }
 0x24c   :  { %v2008_v47 = vmul.f32 %v3097_v13, %v4842_v8  ;;  %v1589_v21 = vpop.f32.mrf.mxu0 }
 0x24d   :  { %3110 = vrcp.f32 %v1962_v63  ;;  %v1892_v49 = vsub.f32 0.0, %v4883_v2  ;;  %v1590_v0 = vadd.f32 %v1589_v21, %v4792_v43  ;;  %v3035_v16 = vpop.f32.mrf.mxu1 }
 0x24e   :  { %v3099_v61 = vpop.eup %3098  ;;  %2033 = vst [vmem:[#allocation2 + $0x28] sm:$0xff] %v2008_v47  ;;  %3112 = vpow2.f32 %v1929_v53  ;;  %v2922_v42 = vpop.f32.mrf.mxu0 }
 0x24f   :  { %v3101_v48 = vpop.eup %3100  ;;  %v1963_v44 = vadd.f32 1.0, %v3099_v61  ;;  %v1931_v38 = vmul.f32 1.442695, %v1892_v49  ;;  %v4888_v6 = vadd.f32 %v1820_v11, %v1590_v0  ;;  %v1838_v33 = vpop.f32.mrf.mxu1 }
 0x250   :  { %v2009_v50 = vmul.f32 %v3101_v48, %v4846_v20  ;;  %v1595_v8 = vpop.f32.mrf.mxu0 }
 0x251   :  { %3114 = vrcp.f32 %v1963_v44  ;;  %v1893_v32 = vsub.f32 0.0, %v4888_v6  ;;  %v1596_v36 = vadd.f32 %v1595_v8, %v4795_v18  ;;  %v3038_v43 = vpop.f32.mrf.mxu1 }
 0x252   :  { %v3103_v55 = vpop.eup %3102  ;;  %2034 = vst [vmem:[#allocation2 + $0x30] sm:$0xff] %v2009_v50  ;;  %3116 = vpow2.f32 %v1931_v38  ;;  %v2925_v39 = vpop.f32.mrf.mxu0 }
 0x253   :  { %v3105_v7 = vpop.eup %3104  ;;  %v1964_v34 = vadd.f32 1.0, %v3103_v55  ;;  %v1933_v28 = vmul.f32 1.442695, %v1893_v32  ;;  %v4893_v59 = vadd.f32 %v1826_v54, %v1596_v36  ;;  %v1844_v11 = vpop.f32.mrf.mxu1 }
 0x254   :  { %v2010_v23 = vmul.f32 %v3105_v7, %v4850_v19  ;;  %v1601_v20 = vpop.f32.mrf.mxu0 }
 0x255   :  { %3118 = vrcp.f32 %v1964_v34  ;;  %v1894_v9 = vsub.f32 0.0, %v4893_v59  ;;  %v1602_v5 = vadd.f32 %v1601_v20, %v4798_v57  ;;  %v3041_v18 = vpop.f32.mrf.mxu1 }
 0x256   :  { %v3107_v41 = vpop.eup %3106  ;;  %2035 = vst [vmem:[#allocation2 + $0x38] sm:$0xff] %v2010_v23  ;;  %3120 = vpow2.f32 %v1933_v28  ;;  %v2928_v52 = vpop.f32.mrf.mxu0 }
 0x257   :  { %v3109_v46 = vpop.eup %3108  ;;  %v2011_v17 = vmul.f32 %v3107_v41, %v4854_v10  ;;  %v1935_v29 = vmul.f32 1.442695, %v1894_v9  ;;  %v4899_v35 = vadd.f32 %v1832_v56, %v1602_v5  ;;  %v1850_v4 = vpop.f32.mrf.mxu1 }
 0x258   :  { %v1965_v54 = vadd.f32 1.0, %v3109_v46  ;;  %v1607_v19 = vpop.f32.mrf.mxu0 }
 0x259   :  { %2036 = vst [vmem:[#allocation2 + $0x40] sm:$0xff] %v2011_v17  ;;  %3122 = vpow2.f32 %v1935_v29  ;;  %v1895_v27 = vsub.f32 0.0, %v4899_v35  ;;  %v1608_v57 = vadd.f32 %v1607_v19, %v4801_v3  ;;  %v3044_v51 = vpop.f32.mrf.mxu1 }
 0x25a   :  { %v3111_v31 = vpop.eup %3110  ;;  %3124 = vrcp.f32 %v1965_v54  ;;  %v2931_v62 = vpop.f32.mrf.mxu0 }
 0x25b   :  { %v3113_v1 = vpop.eup %3112  ;;  %v2012_v58 = vmul.f32 %v3111_v31, %v4859_v37  ;;  %v1937_v10 = vmul.f32 1.442695, %v1895_v27  ;;  %v4904_v30 = vadd.f32 %v1838_v33, %v1608_v57  ;;  %v1856_v13 = vpop.f32.mrf.mxu1 }
 0x25c   :  { %v1966_v63 = vadd.f32 1.0, %v3113_v1  ;;  %v1613_v53 = vpop.f32.mrf.mxu0 }
 0x25d   :  { %2037 = vst [vmem:[#allocation2 + $0x48] sm:$0xff] %v2012_v58  ;;  %3126 = vpow2.f32 %v1937_v10  ;;  %v1896_v56 = vsub.f32 0.0, %v4904_v30  ;;  %v1614_v47 = vadd.f32 %v1613_v53, %v4804_v45  ;;  %v3047_v3 = vpop.f32.mrf.mxu1 }
 0x25e   :  { %v3115_v21 = vpop.eup %3114  ;;  %3128 = vrcp.f32 %v1966_v63  ;;  %v2934_v49 = vpop.f32.mrf.mxu0 }
 0x25f   :  { %v3117_v0 = vpop.eup %3116  ;;  %v2013_v16 = vmul.f32 %v3115_v21, %v4864_v24  ;;  %v1939_v37 = vmul.f32 1.442695, %v1896_v56  ;;  %v4909_v61 = vadd.f32 %v1844_v11, %v1614_v47  ;;  %v1862_v42 = vpop.f32.mrf.mxu1 }
 0x260   :  { %v1967_v48 = vadd.f32 1.0, %v3117_v0  ;;  %v1619_v44 = vpop.f32.mrf.mxu0 }
 0x261   :  { %2038 = vst [vmem:[#allocation2 + $0x50] sm:$0xff] %v2013_v16  ;;  %3130 = vpow2.f32 %v1939_v37  ;;  %v1897_v38 = vsub.f32 0.0, %v4909_v61  ;;  %v1620_v33 = vadd.f32 %v1619_v44, %v4807_v14  ;;  %v3050_v45 = vpop.f32.mrf.mxu1 }
 0x262   :  { %v3119_v50 = vpop.eup %3118  ;;  %3132 = vrcp.f32 %v1967_v48  ;;  %v2937_v8 = vpop.f32.mrf.mxu0 }
 0x263   :  { %v3121_v32 = vpop.eup %3120  ;;  %v2014_v36 = vmul.f32 %v3119_v50, %v4869_v12  ;;  %v1941_v24 = vmul.f32 1.442695, %v1897_v38  ;;  %v4914_v43 = vadd.f32 %v1850_v4, %v1620_v33  ;;  %v1868_v55 = vpop.f32.mrf.mxu1 }
 0x264   :  { %v1968_v39 = vadd.f32 1.0, %v3121_v32  ;;  %v1625_v7 = vpop.f32.mrf.mxu0 }
 0x265   :  { %2039 = vst [vmem:[#allocation2 + $0x58] sm:$0xff] %v2014_v36  ;;  %3134 = vpow2.f32 %v1941_v24  ;;  %v1898_v34 = vsub.f32 0.0, %v4914_v43  ;;  %v1626_v28 = vadd.f32 %v1625_v7, %v4810_v15  ;;  %v3053_v14 = vpop.f32.mrf.mxu1 }
 0x266   :  { %v3123_v11 = vpop.eup %3122  ;;  %3136 = vrcp.f32 %v1968_v39  ;;  %v2940_v23 = vpop.f32.mrf.mxu0 }
 0x267   :  { %v3125_v20 = vpop.eup %3124  ;;  %v1969_v9 = vadd.f32 1.0, %v3123_v11  ;;  %v1943_v5 = vmul.f32 1.442695, %v1898_v34  ;;  %v4918_v12 = vadd.f32 %v1856_v13, %v1626_v28  ;;  %v1874_v18 = vpop.f32.mrf.mxu1 }
 0x268   :  { %v2015_v41 = vmul.f32 %v3125_v20, %v4874_v22  ;;  %v1631_v52 = vpop.f32.mrf.mxu0 }
 0x269   :  { %3138 = vrcp.f32 %v1969_v9  ;;  %v1899_v46 = vsub.f32 0.0, %v4918_v12  ;;  %v1632_v17 = vadd.f32 %v1631_v52, %v4813_v25  ;;  %v3056_v29 = vpop.f32.mrf.mxu1 }
 0x26a   :  { %v3127_v15 = vpop.eup %3126  ;;  %2040 = vst [vmem:[#allocation2 + $0x60] sm:$0xff] %v2015_v41  ;;  %3140 = vpow2.f32 %v1943_v5  ;;  %v2943_v4 = vpop.f32.mrf.mxu0 }
 0x26b   :  { %v3129_v54 = vpop.eup %3128  ;;  %v1970_v19 = vadd.f32 1.0, %v3127_v15  ;;  %v1945_v27 = vmul.f32 1.442695, %v1899_v46  ;;  %v4923_v57 = vadd.f32 %v1862_v42, %v1632_v17 }
 0x26c   :  { %v2016_v51 = vmul.f32 %v3129_v54, %v4878_v26  ;;  %v1637_v31 = vpop.f32.mrf.mxu0 }
 0x26d   :  { %3142 = vrcp.f32 %v1970_v19  ;;  %v1900_v22 = vsub.f32 0.0, %v4923_v57  ;;  %v1638_v62 = vadd.f32 %v1637_v31, %v4816_v60 }
 0x26e   :  { %v3131_v1 = vpop.eup %3130  ;;  %2041 = vst [vmem:[#allocation2 + $0x68] sm:$0xff] %v2016_v51  ;;  %3144 = vpow2.f32 %v1945_v27  ;;  %v2946_v25 = vpop.f32.mrf.mxu0 }
 0x26f   :  { %v3133_v58 = vpop.eup %3132  ;;  %v1971_v10 = vadd.f32 1.0, %v3131_v1  ;;  %v1947_v13 = vmul.f32 1.442695, %v1900_v22  ;;  %v1869_v63 = vadd.f32 %v1868_v55, %v1638_v62 }
 0x270   :  { %v2017_v53 = vmul.f32 %v3133_v58, %v4883_v2  ;;  %v1643_v56 = vpop.f32.mrf.mxu0 }
 0x271   :  { %3146 = vrcp.f32 %v1971_v10  ;;  %v1901_v47 = vsub.f32 0.0, %v1869_v63  ;;  %v1644_v26 = vadd.f32 %v1643_v56, %v4819_v40 }
 0x272   :  { %v3135_v3 = vpop.eup %3134  ;;  %2042 = vst [vmem:[#allocation2 + $0x70] sm:$0xff] %v2017_v53  ;;  %3148 = vpow2.f32 %v1947_v13  ;;  %v2949_v21 = vpop.f32.mrf.mxu0 }
 0x273   :  { %v3137_v60 = vpop.eup %3136  ;;  %v1972_v49 = vadd.f32 1.0, %v3135_v3  ;;  %v1949_v0 = vmul.f32 1.442695, %v1901_v47  ;;  %v1875_v16 = vadd.f32 %v1874_v18, %v1644_v26 }
 0x274   :  { %v2018_v37 = vmul.f32 %v3137_v60, %v4888_v6 }
 0x275   :  { %3150 = vrcp.f32 %v1972_v49  ;;  %v1902_v42 = vsub.f32 0.0, %v1875_v16 }
 0x276   :  { %v3139_v48 = vpop.eup %3138  ;;  %2043 = vst [vmem:[#allocation2 + $0x78] sm:$0xff] %v2018_v37  ;;  %3152 = vpow2.f32 %v1949_v0 }
 0x277   :  { %v3141_v2 = vpop.eup %3140  ;;  %v2019_v44 = vmul.f32 %v3139_v48, %v4893_v59  ;;  %v1951_v38 = vmul.f32 1.442695, %v1902_v42 }
 0x278   :  { %v1973_v40 = vadd.f32 1.0, %v3141_v2 }
 0x279   :  { %2044 = vst [vmem:[#allocation2 + $0x80] sm:$0xff] %v2019_v44  ;;  %3154 = vpow2.f32 %v1951_v38 }
 0x27a   :  { %v3143_v33 = vpop.eup %3142  ;;  %3156 = vrcp.f32 %v1973_v40 }
 0x27b   :  { %v3145_v45 = vpop.eup %3144  ;;  %v2020_v50 = vmul.f32 %v3143_v33, %v4899_v35 }
 0x27c   :  { %v1974_v8 = vadd.f32 1.0, %v3145_v45 }
 0x27d   :  { %2045 = vst [vmem:[#allocation2 + $0x88] sm:$0xff] %v2020_v50 }
 0x27e   :  { %v3147_v6 = vpop.eup %3146  ;;  %3158 = vrcp.f32 %v1974_v8 }
 0x27f   :  { %v3149_v32 = vpop.eup %3148  ;;  %v2021_v36 = vmul.f32 %v3147_v6, %v4904_v30 }
 0x280   :  { %v1975_v24 = vadd.f32 1.0, %v3149_v32 }
 0x281   :  { %2046 = vst [vmem:[#allocation2 + $0x90] sm:$0xff] %v2021_v36 }
 0x282   :  { %v3151_v55 = vpop.eup %3150  ;;  %3160 = vrcp.f32 %v1975_v24 }
 0x283   :  { %v3153_v59 = vpop.eup %3152  ;;  %v2022_v39 = vmul.f32 %v3151_v55, %v4909_v61 }
 0x284   :  { %v1976_v7 = vadd.f32 1.0, %v3153_v59 }
 0x285   :  { %2047 = vst [vmem:[#allocation2 + $0x98] sm:$0xff] %v2022_v39 }
 0x286   :  { %v3155_v34 = vpop.eup %3154  ;;  %3162 = vrcp.f32 %v1976_v7 }
 0x287   :  { %v3157_v28 = vpop.eup %3156  ;;  %v1977_v35 = vadd.f32 1.0, %v3155_v34 }
 0x288   :  { %v2023_v14 = vmul.f32 %v3157_v28, %v4914_v43 }
 0x289   :  { %3164 = vrcp.f32 %v1977_v35 }
 0x28a   :  { %2048 = vst [vmem:[#allocation2 + $0xa0] sm:$0xff] %v2023_v14 }
 0x28b   :  { %v3159_v11 = vpop.eup %3158 }
 0x28c   :  { %v2024_v30 = vmul.f32 %v3159_v11, %v4918_v12 }
 0x28e   :  { %2049 = vst [vmem:[#allocation2 + $0xa8] sm:$0xff] %v2024_v30 }
 0x28f   :  { %v3161_v23 = vpop.eup %3160 }
 0x290   :  { %v2025_v20 = vmul.f32 %v3161_v23, %v4923_v57 }
 0x292   :  { %2050 = vst [vmem:[#allocation2 + $0xb0] sm:$0xff] %v2025_v20 }
 0x293   :  { %v3163_v9 = vpop.eup %3162 }
 0x294   :  { %v2026_v61 = vmul.f32 %v3163_v9, %v1869_v63 }
 0x296   :  { %v3165_v5 = vpop.eup %3164  ;;  %2051 = vst [vmem:[#allocation2 + $0xb8] sm:$0xff] %v2026_v61 }
 0x297   :  { %v2027_v18 = vmul.f32 %v3165_v5, %v1875_v16 }
 0x299   :  { %2052 = vst [vmem:[#allocation2 + $0xc0] sm:$0xff] %v2027_v18 }
 0x29a   :  { %3177 = shalt.err (!%p3174_p4)
}
 0x29b   :  { %s3193_s8 = smov 128   ;;  %s3194_s9 = smov 8  }
 0x29c   :  { %2064 = dma.vmem_to_hbm [thread:$0]  %s2059_s6, 3200, %s4943_s2, [#allocation3], %s3193_s8, %s3193_s8, %s3194_s9  }
 0x29d   :  { %3186 = dma.done.wait [#allocation3], 3200  }
 0x29e   :  { %3187 = vsyncadd [#allocation3], 4294964096 }
 0x29f   :  { %2068 = vsyncpa [#allocation3], 1 }

</bundles_post_ra>
